<compile_context>
chip_gen: v7x
topology: tpu7x:2x2x1
jax: 0.10.0
libtpu: 0.0.40
codegen_flags: <defaults>
</compile_context>

<pallas_src>
import math

import jax
import jax.numpy as jnp
from jax.experimental import pallas as pl
from jax.experimental.pallas import tpu as pltpu

# Small, forward-consistent shapes (hidden scaled down from 768 -> 32).
B, S, H, F, VOCAB = 2, 8, 32, 64, 100
HP, FP = 128, 128          # lane-dense padded widths
BB = 2 * B                 # source + target stacked along batch


def _layernorm_padded(x, gamma, beta, eps=1e-12):
    # x has zeros in the padded lanes (>= H), so sums over HP equal sums over H.
    # Use E[x^2] - mu^2 so the padded lanes never contaminate the statistics;
    # gamma/beta are zero in the padded lanes, keeping the output zero there.
    mu = jnp.sum(x, axis=-1, keepdims=True) * (1.0 / H)
    var = jnp.sum(x * x, axis=-1, keepdims=True) * (1.0 / H) - mu * mu
    return (x - mu) * jax.lax.rsqrt(var + eps) * gamma + beta


def fused_style_kernel(x_ref, amask_ref, pool_ref,
                       wq_ref, bq_ref, wk_ref, bk_ref, wv_ref, bv_ref,
                       wo_ref, bo_ref, g1_ref, be1_ref,
                       w1_ref, bf1_ref, w2_ref, bf2_ref, g2_ref, be2_ref,
                       wd_ref, bd_ref, out_ref):
    # x_ref: (BB, S, HP) embedded tokens; rows [0:B] = source, [B:BB] = target.
    # amask_ref: (BB, 1, S) float attention mask (keys).
    # pool_ref: (BB, BB*S) normalized block-diagonal masked-mean-pool matrix.
    x3 = x_ref[...]
    amask = amask_ref[...]
    x = x3.reshape(BB * S, HP)                     # 2D for MXU-friendly matmuls

    q = jnp.dot(x, wq_ref[...], preferred_element_type=jnp.float32) + bq_ref[...]
    k = jnp.dot(x, wk_ref[...], preferred_element_type=jnp.float32) + bk_ref[...]
    v = jnp.dot(x, wv_ref[...], preferred_element_type=jnp.float32) + bv_ref[...]
    q3 = q.reshape(BB, S, HP)
    k3 = k.reshape(BB, S, HP)
    v3 = v.reshape(BB, S, HP)

    # TODO(synk): single attention head stands in for BERT's multi-head attention.
    # Contract on the last axes (no explicit transpose).
    scores = jnp.einsum('bqd,bkd->bqk', q3, k3,
                        preferred_element_type=jnp.float32) * (1.0 / math.sqrt(H))
    scores = scores + (1.0 - amask) * (-1e9)       # (BB,1,S) broadcasts over queries
    scores = scores - jnp.max(scores, axis=-1, keepdims=True)
    p = jnp.exp(scores)
    p = p * pl.reciprocal(jnp.sum(p, axis=-1, keepdims=True), approx=True)

    attn = jnp.einsum('bqk,bkd->bqd', p, v3, preferred_element_type=jnp.float32)
    attn = attn.reshape(BB * S, HP)
    attn = jnp.dot(attn, wo_ref[...], preferred_element_type=jnp.float32) + bo_ref[...]

    h = _layernorm_padded(x + attn, g1_ref[...], be1_ref[...])

    ff = jnp.dot(h, w1_ref[...], preferred_element_type=jnp.float32) + bf1_ref[...]
    ff = jax.nn.gelu(ff)
    ff = jnp.dot(ff, w2_ref[...], preferred_element_type=jnp.float32) + bf2_ref[...]

    y = _layernorm_padded(h + ff, g2_ref[...], be2_ref[...])       # (BB*S, HP)

    # Masked mean pool over the sequence as one matmul.
    # TODO(synk): BertForMaskedLM output index [1] is ambiguous without labels;
    # interpreted here as a pooled sentence representation.
    pooled = jnp.dot(pool_ref[...], y, preferred_element_type=jnp.float32)  # (BB, HP)

    enc_src = pooled[:B]                           # encoded_text
    enc_tgt = pooled[B:]                           # encoded target_style
    style = jnp.dot(enc_src, wd_ref[...],
                    preferred_element_type=jnp.float32) + bd_ref[...]
    # output_style = target_style + (style - target_style)  (kept verbatim)
    out_ref[...] = enc_tgt + (style - enc_tgt)


_W_NAMES = ("wq", "bq", "wk", "bk", "wv", "bv", "wo", "bo",
            "g1", "be1", "w1", "bf1", "w2", "bf2", "g2", "be2",
            "wd", "bd")


def make_params():
    key = jax.random.PRNGKey(1)
    ks = list(jax.random.split(key, 16))

    def initp(k, real_shape, pad_shape, scale=0.02):
        w = (scale * jax.random.normal(k, real_shape)).astype(jnp.float32)
        buf = jnp.zeros(pad_shape, jnp.float32)
        return buf.at[tuple(slice(0, d) for d in real_shape)].set(w)

    ones_h = jnp.zeros((1, HP), jnp.float32).at[:, :H].set(1.0)
    zeros_h = jnp.zeros((1, HP), jnp.float32)
    zeros_f = jnp.zeros((1, FP), jnp.float32)

    return {
        "tok_emb": initp(ks[0], (VOCAB, H), (VOCAB, HP)),
        "pos_emb": initp(ks[1], (S, H), (S, HP)),
        # encoder layer weights, (in, out) layout, zero-padded to lane width
        "wq": initp(ks[2], (H, H), (HP, HP)), "bq": zeros_h,
        "wk": initp(ks[3], (H, H), (HP, HP)), "bk": zeros_h,
        "wv": initp(ks[4], (H, H), (HP, HP)), "bv": zeros_h,
        "wo": initp(ks[5], (H, H), (HP, HP)), "bo": zeros_h,
        "g1": ones_h, "be1": zeros_h,
        "w1": initp(ks[6], (H, F), (HP, FP)), "bf1": zeros_f,
        "w2": initp(ks[7], (F, H), (FP, HP)), "bf2": zeros_h,
        "g2": ones_h, "be2": zeros_h,
        # decoder: nn.Linear(H, H)
        "wd": initp(ks[8], (H, H), (HP, HP)), "bd": initp(ks[9], (1, H), (1, HP)),
    }


def embed(token_ids, params):
    # TODO(synk): embedding gather stays in XLA glue (no tidy tiled form at this size).
    return (params["tok_emb"][token_ids] + params["pos_emb"][None, :, :]).astype(jnp.float32)


def build_pool_matrix(mask_2d):
    # mask_2d: (BB, S) float. Returns (BB, BB*S) block-diagonal, row-normalized.
    denom = jnp.maximum(jnp.sum(mask_2d, axis=-1, keepdims=True), 1.0)
    w = mask_2d / denom
    eye = jnp.eye(BB, dtype=jnp.float32)
    return (eye[:, :, None] * w[None, :, :]).reshape(BB, BB * S)


def style_transfer_forward(input_ids, attention_mask, target_style, params):
    # Stack source text and target style into one batch -> single kernel call.
    src_emb = embed(input_ids, params)                       # (B, S, HP)
    tgt_emb = embed(target_style, params)                    # (B, S, HP) (no mask -> ones)
    x = jnp.concatenate([src_emb, tgt_emb], axis=0)          # (BB, S, HP)
    mask_full = jnp.concatenate(
        [attention_mask.astype(jnp.float32), jnp.ones((B, S), jnp.float32)], axis=0)
    amask = mask_full[:, None, :]                            # (BB, 1, S)
    pool_mat = build_pool_matrix(mask_full)                  # (BB, BB*S)

    weights = [params[n] for n in _W_NAMES]
    out = pl.pallas_call(
        fused_style_kernel,
        out_shape=jax.ShapeDtypeStruct((B, HP), jnp.float32),
        compiler_params=pltpu.CompilerParams(vmem_limit_bytes=8 * 1024 * 1024),
    )(x, amask, pool_mat, *weights)
    return out[:, :H]                                        # drop lane padding


if __name__ == "__main__":
    params = make_params()

    key = jax.random.PRNGKey(0)
    k1, k2 = jax.random.split(key)
    input_ids = jax.random.randint(k1, (B, S), 0, VOCAB, dtype=jnp.int32)
    target_style = jax.random.randint(k2, (B, S), 0, VOCAB, dtype=jnp.int32)
    attention_mask = jnp.ones((B, S), jnp.int32).at[1, 6:].set(0)

    fwd = jax.jit(style_transfer_forward)
    out = fwd(input_ids, attention_mask, target_style, params)
    out = jax.block_until_ready(out)
    assert out.shape == (B, H) and out.dtype == jnp.float32
    assert bool(jnp.all(jnp.isfinite(out)))
    print("KERNEL_OK")
</pallas_src>

<mosaic_0001>
module attributes {stable_mosaic.version = 11 : i64} {
  func.func @fused_style_kernel(%arg0: memref<4x8x128xf32, #tpu.memory_space<vmem>>, %arg1: memref<4x1x8xf32, #tpu.memory_space<vmem>>, %arg2: memref<4x32xf32, #tpu.memory_space<vmem>>, %arg3: memref<128x128xf32, #tpu.memory_space<vmem>>, %arg4: memref<1x128xf32, #tpu.memory_space<vmem>>, %arg5: memref<128x128xf32, #tpu.memory_space<vmem>>, %arg6: memref<1x128xf32, #tpu.memory_space<vmem>>, %arg7: memref<128x128xf32, #tpu.memory_space<vmem>>, %arg8: memref<1x128xf32, #tpu.memory_space<vmem>>, %arg9: memref<128x128xf32, #tpu.memory_space<vmem>>, %arg10: memref<1x128xf32, #tpu.memory_space<vmem>>, %arg11: memref<1x128xf32, #tpu.memory_space<vmem>>, %arg12: memref<1x128xf32, #tpu.memory_space<vmem>>, %arg13: memref<128x128xf32, #tpu.memory_space<vmem>>, %arg14: memref<1x128xf32, #tpu.memory_space<vmem>>, %arg15: memref<128x128xf32, #tpu.memory_space<vmem>>, %arg16: memref<1x128xf32, #tpu.memory_space<vmem>>, %arg17: memref<1x128xf32, #tpu.memory_space<vmem>>, %arg18: memref<1x128xf32, #tpu.memory_space<vmem>>, %arg19: memref<128x128xf32, #tpu.memory_space<vmem>>, %arg20: memref<1x128xf32, #tpu.memory_space<vmem>>, %arg21: memref<2x128xf32, #tpu.memory_space<vmem>>) attributes {dimension_semantics = [], scalar_prefetch = 0 : i64, scratch_operands = 0 : i64, tpu.core_type = #tpu.core_type<tc>} {
    %c0 = arith.constant 0 : index
    %c0_0 = arith.constant 0 : index
    %c0_1 = arith.constant 0 : index
    %0 = vector.load %arg0[%c0, %c0_0, %c0_1] : memref<4x8x128xf32, #tpu.memory_space<vmem>>, vector<4x8x128xf32>
    %c0_2 = arith.constant 0 : index
    %c0_3 = arith.constant 0 : index
    %c0_4 = arith.constant 0 : index
    %1 = vector.load %arg1[%c0_2, %c0_3, %c0_4] : memref<4x1x8xf32, #tpu.memory_space<vmem>>, vector<4x1x8xf32>
    %2 = vector.shape_cast %0 : vector<4x8x128xf32> to vector<32x128xf32>
    %c0_5 = arith.constant 0 : index
    %c0_6 = arith.constant 0 : index
    %3 = vector.load %arg3[%c0_5, %c0_6] : memref<128x128xf32, #tpu.memory_space<vmem>>, vector<128x128xf32>
    %cst = arith.constant dense<0.000000e+00> : vector<32x128xf32>
    %4 = tpu.matmul %2, %3, %cst {dimension_numbers = #tpu.dot_dimension_numbers<[1], [0], [0], [1], [0, 0, 1, 1], [], []>} : vector<32x128xf32>, vector<128x128xf32>, vector<32x128xf32> -> vector<32x128xf32>
    %c0_7 = arith.constant 0 : index
    %c0_8 = arith.constant 0 : index
    %5 = vector.load %arg4[%c0_7, %c0_8] : memref<1x128xf32, #tpu.memory_space<vmem>>, vector<1x128xf32>
    %6 = vector.broadcast %5 : vector<1x128xf32> to vector<32x128xf32>
    %7 = arith.addf %4, %6 : vector<32x128xf32>
    %c0_9 = arith.constant 0 : index
    %c0_10 = arith.constant 0 : index
    %8 = vector.load %arg5[%c0_9, %c0_10] : memref<128x128xf32, #tpu.memory_space<vmem>>, vector<128x128xf32>
    %cst_11 = arith.constant dense<0.000000e+00> : vector<32x128xf32>
    %9 = tpu.matmul %2, %8, %cst_11 {dimension_numbers = #tpu.dot_dimension_numbers<[1], [0], [0], [1], [0, 0, 1, 1], [], []>} : vector<32x128xf32>, vector<128x128xf32>, vector<32x128xf32> -> vector<32x128xf32>
    %c0_12 = arith.constant 0 : index
    %c0_13 = arith.constant 0 : index
    %10 = vector.load %arg6[%c0_12, %c0_13] : memref<1x128xf32, #tpu.memory_space<vmem>>, vector<1x128xf32>
    %11 = vector.broadcast %10 : vector<1x128xf32> to vector<32x128xf32>
    %12 = arith.addf %9, %11 : vector<32x128xf32>
    %c0_14 = arith.constant 0 : index
    %c0_15 = arith.constant 0 : index
    %13 = vector.load %arg7[%c0_14, %c0_15] : memref<128x128xf32, #tpu.memory_space<vmem>>, vector<128x128xf32>
    %cst_16 = arith.constant dense<0.000000e+00> : vector<32x128xf32>
    %14 = tpu.matmul %2, %13, %cst_16 {dimension_numbers = #tpu.dot_dimension_numbers<[1], [0], [0], [1], [0, 0, 1, 1], [], []>} : vector<32x128xf32>, vector<128x128xf32>, vector<32x128xf32> -> vector<32x128xf32>
    %c0_17 = arith.constant 0 : index
    %c0_18 = arith.constant 0 : index
    %15 = vector.load %arg8[%c0_17, %c0_18] : memref<1x128xf32, #tpu.memory_space<vmem>>, vector<1x128xf32>
    %16 = vector.broadcast %15 : vector<1x128xf32> to vector<32x128xf32>
    %17 = arith.addf %14, %16 : vector<32x128xf32>
    %18 = vector.shape_cast %7 : vector<32x128xf32> to vector<4x8x128xf32>
    %19 = vector.shape_cast %12 : vector<32x128xf32> to vector<4x8x128xf32>
    %20 = vector.shape_cast %17 : vector<32x128xf32> to vector<4x8x128xf32>
    "tpu.trace_start"() <{level = 10 : i32, message = "bqd,bkd->bqk"}> : () -> ()
    %cst_19 = arith.constant dense<0.000000e+00> : vector<4x8x8xf32>
    %21 = tpu.matmul %18, %19, %cst_19 {dimension_numbers = #tpu.dot_dimension_numbers<[2], [2], [1], [1], [0, 0, 0, 1, 1, 1], [0], [0]>} : vector<4x8x128xf32>, vector<4x8x128xf32>, vector<4x8x8xf32> -> vector<4x8x8xf32>
    "tpu.trace_stop"() : () -> ()
    %cst_20 = arith.constant 0.176776692 : f32
    %22 = vector.broadcast %cst_20 : f32 to vector<4x8x8xf32>
    %23 = arith.mulf %21, %22 : vector<4x8x8xf32>
    %cst_21 = arith.constant 1.000000e+00 : f32
    %24 = vector.broadcast %cst_21 : f32 to vector<4x1x8xf32>
    %25 = arith.subf %24, %1 : vector<4x1x8xf32>
    %cst_22 = arith.constant -1.000000e+09 : f32
    %26 = vector.broadcast %cst_22 : f32 to vector<4x1x8xf32>
    %27 = arith.mulf %25, %26 : vector<4x1x8xf32>
    %28 = vector.broadcast %27 : vector<4x1x8xf32> to vector<4x8x8xf32>
    %29 = arith.addf %23, %28 : vector<4x8x8xf32>
    %cst_23 = arith.constant dense<0xFF800000> : vector<4x8xf32>
    %30 = vector.multi_reduction <maximumf>, %29, %cst_23 [2] : vector<4x8x8xf32> to vector<4x8xf32>
    %31 = vector.shape_cast %30 : vector<4x8xf32> to vector<4x8x1xf32>
    %32 = vector.broadcast %31 : vector<4x8x1xf32> to vector<4x8x8xf32>
    %33 = arith.subf %29, %32 : vector<4x8x8xf32>
    %34 = math.exp %33 : vector<4x8x8xf32>
    %cst_24 = arith.constant dense<0.000000e+00> : vector<4x8xf32>
    %35 = vector.multi_reduction <add>, %34, %cst_24 [2] : vector<4x8x8xf32> to vector<4x8xf32>
    %36 = vector.shape_cast %35 : vector<4x8xf32> to vector<4x8x1xf32>
    %37 = tpu.reciprocal %36 {approx = true} : vector<4x8x1xf32> -> vector<4x8x1xf32>
    %38 = vector.broadcast %37 : vector<4x8x1xf32> to vector<4x8x8xf32>
    %39 = arith.mulf %34, %38 : vector<4x8x8xf32>
    "tpu.trace_start"() <{level = 10 : i32, message = "bqk,bkd->bqd"}> : () -> ()
    %cst_25 = arith.constant dense<0.000000e+00> : vector<4x8x128xf32>
    %40 = tpu.matmul %39, %20, %cst_25 {dimension_numbers = #tpu.dot_dimension_numbers<[2], [1], [1], [2], [0, 0, 0, 1, 1, 2], [0], [0]>} : vector<4x8x8xf32>, vector<4x8x128xf32>, vector<4x8x128xf32> -> vector<4x8x128xf32>
    "tpu.trace_stop"() : () -> ()
    %41 = vector.shape_cast %40 : vector<4x8x128xf32> to vector<32x128xf32>
    %c0_26 = arith.constant 0 : index
    %c0_27 = arith.constant 0 : index
    %42 = vector.load %arg9[%c0_26, %c0_27] : memref<128x128xf32, #tpu.memory_space<vmem>>, vector<128x128xf32>
    %cst_28 = arith.constant dense<0.000000e+00> : vector<32x128xf32>
    %43 = tpu.matmul %41, %42, %cst_28 {dimension_numbers = #tpu.dot_dimension_numbers<[1], [0], [0], [1], [0, 0, 1, 1], [], []>} : vector<32x128xf32>, vector<128x128xf32>, vector<32x128xf32> -> vector<32x128xf32>
    %c0_29 = arith.constant 0 : index
    %c0_30 = arith.constant 0 : index
    %44 = vector.load %arg10[%c0_29, %c0_30] : memref<1x128xf32, #tpu.memory_space<vmem>>, vector<1x128xf32>
    %45 = vector.broadcast %44 : vector<1x128xf32> to vector<32x128xf32>
    %46 = arith.addf %43, %45 : vector<32x128xf32>
    %47 = arith.addf %2, %46 : vector<32x128xf32>
    %c0_31 = arith.constant 0 : index
    %c0_32 = arith.constant 0 : index
    %48 = vector.load %arg11[%c0_31, %c0_32] : memref<1x128xf32, #tpu.memory_space<vmem>>, vector<1x128xf32>
    %c0_33 = arith.constant 0 : index
    %c0_34 = arith.constant 0 : index
    %49 = vector.load %arg12[%c0_33, %c0_34] : memref<1x128xf32, #tpu.memory_space<vmem>>, vector<1x128xf32>
    %cst_35 = arith.constant dense<0.000000e+00> : vector<32xf32>
    %50 = vector.multi_reduction <add>, %47, %cst_35 [1] : vector<32x128xf32> to vector<32xf32>
    %51 = vector.shape_cast %50 : vector<32xf32> to vector<32x1xf32>
    %cst_36 = arith.constant 3.125000e-02 : f32
    %52 = vector.broadcast %cst_36 : f32 to vector<32x1xf32>
    %53 = arith.mulf %51, %52 : vector<32x1xf32>
    %54 = arith.mulf %47, %47 : vector<32x128xf32>
    %cst_37 = arith.constant dense<0.000000e+00> : vector<32xf32>
    %55 = vector.multi_reduction <add>, %54, %cst_37 [1] : vector<32x128xf32> to vector<32xf32>
    %56 = vector.shape_cast %55 : vector<32xf32> to vector<32x1xf32>
    %cst_38 = arith.constant 3.125000e-02 : f32
    %57 = vector.broadcast %cst_38 : f32 to vector<32x1xf32>
    %58 = arith.mulf %56, %57 : vector<32x1xf32>
    %59 = arith.mulf %53, %53 : vector<32x1xf32>
    %60 = arith.subf %58, %59 : vector<32x1xf32>
    %61 = vector.broadcast %53 : vector<32x1xf32> to vector<32x128xf32>
    %62 = arith.subf %47, %61 : vector<32x128xf32>
    %cst_39 = arith.constant 9.99999996E-13 : f32
    %63 = vector.broadcast %cst_39 : f32 to vector<32x1xf32>
    %64 = arith.addf %60, %63 : vector<32x1xf32>
    %65 = math.rsqrt %64 : vector<32x1xf32>
    %66 = vector.broadcast %65 : vector<32x1xf32> to vector<32x128xf32>
    %67 = arith.mulf %62, %66 : vector<32x128xf32>
    %68 = vector.broadcast %48 : vector<1x128xf32> to vector<32x128xf32>
    %69 = arith.mulf %67, %68 : vector<32x128xf32>
    %70 = vector.broadcast %49 : vector<1x128xf32> to vector<32x128xf32>
    %71 = arith.addf %69, %70 : vector<32x128xf32>
    %c0_40 = arith.constant 0 : index
    %c0_41 = arith.constant 0 : index
    %72 = vector.load %arg13[%c0_40, %c0_41] : memref<128x128xf32, #tpu.memory_space<vmem>>, vector<128x128xf32>
    %cst_42 = arith.constant dense<0.000000e+00> : vector<32x128xf32>
    %73 = tpu.matmul %71, %72, %cst_42 {dimension_numbers = #tpu.dot_dimension_numbers<[1], [0], [0], [1], [0, 0, 1, 1], [], []>} : vector<32x128xf32>, vector<128x128xf32>, vector<32x128xf32> -> vector<32x128xf32>
    %c0_43 = arith.constant 0 : index
    %c0_44 = arith.constant 0 : index
    %74 = vector.load %arg14[%c0_43, %c0_44] : memref<1x128xf32, #tpu.memory_space<vmem>>, vector<1x128xf32>
    %75 = vector.broadcast %74 : vector<1x128xf32> to vector<32x128xf32>
    %76 = arith.addf %73, %75 : vector<32x128xf32>
    %77 = arith.mulf %76, %76 : vector<32x128xf32>
    %78 = arith.mulf %76, %77 : vector<32x128xf32>
    %cst_45 = arith.constant 4.471500e-02 : f32
    %79 = vector.broadcast %cst_45 : f32 to vector<32x128xf32>
    %80 = arith.mulf %79, %78 : vector<32x128xf32>
    %81 = arith.addf %76, %80 : vector<32x128xf32>
    %cst_46 = arith.constant 0.797884583 : f32
    %82 = vector.broadcast %cst_46 : f32 to vector<32x128xf32>
    %83 = arith.mulf %82, %81 : vector<32x128xf32>
    %84 = math.tanh %83 : vector<32x128xf32>
    %cst_47 = arith.constant 1.000000e+00 : f32
    %85 = vector.broadcast %cst_47 : f32 to vector<32x128xf32>
    %86 = arith.addf %85, %84 : vector<32x128xf32>
    %cst_48 = arith.constant 5.000000e-01 : f32
    %87 = vector.broadcast %cst_48 : f32 to vector<32x128xf32>
    %88 = arith.mulf %87, %86 : vector<32x128xf32>
    %89 = arith.mulf %76, %88 : vector<32x128xf32>
    %c0_49 = arith.constant 0 : index
    %c0_50 = arith.constant 0 : index
    %90 = vector.load %arg15[%c0_49, %c0_50] : memref<128x128xf32, #tpu.memory_space<vmem>>, vector<128x128xf32>
    %cst_51 = arith.constant dense<0.000000e+00> : vector<32x128xf32>
    %91 = tpu.matmul %89, %90, %cst_51 {dimension_numbers = #tpu.dot_dimension_numbers<[1], [0], [0], [1], [0, 0, 1, 1], [], []>} : vector<32x128xf32>, vector<128x128xf32>, vector<32x128xf32> -> vector<32x128xf32>
    %c0_52 = arith.constant 0 : index
    %c0_53 = arith.constant 0 : index
    %92 = vector.load %arg16[%c0_52, %c0_53] : memref<1x128xf32, #tpu.memory_space<vmem>>, vector<1x128xf32>
    %93 = vector.broadcast %92 : vector<1x128xf32> to vector<32x128xf32>
    %94 = arith.addf %91, %93 : vector<32x128xf32>
    %95 = arith.addf %71, %94 : vector<32x128xf32>
    %c0_54 = arith.constant 0 : index
    %c0_55 = arith.constant 0 : index
    %96 = vector.load %arg17[%c0_54, %c0_55] : memref<1x128xf32, #tpu.memory_space<vmem>>, vector<1x128xf32>
    %c0_56 = arith.constant 0 : index
    %c0_57 = arith.constant 0 : index
    %97 = vector.load %arg18[%c0_56, %c0_57] : memref<1x128xf32, #tpu.memory_space<vmem>>, vector<1x128xf32>
    %cst_58 = arith.constant dense<0.000000e+00> : vector<32xf32>
    %98 = vector.multi_reduction <add>, %95, %cst_58 [1] : vector<32x128xf32> to vector<32xf32>
    %99 = vector.shape_cast %98 : vector<32xf32> to vector<32x1xf32>
    %cst_59 = arith.constant 3.125000e-02 : f32
    %100 = vector.broadcast %cst_59 : f32 to vector<32x1xf32>
    %101 = arith.mulf %99, %100 : vector<32x1xf32>
    %102 = arith.mulf %95, %95 : vector<32x128xf32>
    %cst_60 = arith.constant dense<0.000000e+00> : vector<32xf32>
    %103 = vector.multi_reduction <add>, %102, %cst_60 [1] : vector<32x128xf32> to vector<32xf32>
    %104 = vector.shape_cast %103 : vector<32xf32> to vector<32x1xf32>
    %cst_61 = arith.constant 3.125000e-02 : f32
    %105 = vector.broadcast %cst_61 : f32 to vector<32x1xf32>
    %106 = arith.mulf %104, %105 : vector<32x1xf32>
    %107 = arith.mulf %101, %101 : vector<32x1xf32>
    %108 = arith.subf %106, %107 : vector<32x1xf32>
    %109 = vector.broadcast %101 : vector<32x1xf32> to vector<32x128xf32>
    %110 = arith.subf %95, %109 : vector<32x128xf32>
    %cst_62 = arith.constant 9.99999996E-13 : f32
    %111 = vector.broadcast %cst_62 : f32 to vector<32x1xf32>
    %112 = arith.addf %108, %111 : vector<32x1xf32>
    %113 = math.rsqrt %112 : vector<32x1xf32>
    %114 = vector.broadcast %113 : vector<32x1xf32> to vector<32x128xf32>
    %115 = arith.mulf %110, %114 : vector<32x128xf32>
    %116 = vector.broadcast %96 : vector<1x128xf32> to vector<32x128xf32>
    %117 = arith.mulf %115, %116 : vector<32x128xf32>
    %118 = vector.broadcast %97 : vector<1x128xf32> to vector<32x128xf32>
    %119 = arith.addf %117, %118 : vector<32x128xf32>
    %c0_63 = arith.constant 0 : index
    %c0_64 = arith.constant 0 : index
    %120 = vector.load %arg2[%c0_63, %c0_64] : memref<4x32xf32, #tpu.memory_space<vmem>>, vector<4x32xf32>
    %cst_65 = arith.constant dense<0.000000e+00> : vector<4x128xf32>
    %121 = tpu.matmul %120, %119, %cst_65 {dimension_numbers = #tpu.dot_dimension_numbers<[1], [0], [0], [1], [0, 0, 1, 1], [], []>} : vector<4x32xf32>, vector<32x128xf32>, vector<4x128xf32> -> vector<4x128xf32>
    %122 = vector.extract_strided_slice %121 {offsets = [0, 0], sizes = [2, 128], strides = [1, 1]} : vector<4x128xf32> to vector<2x128xf32>
    %123 = vector.extract_strided_slice %121 {offsets = [2, 0], sizes = [2, 128], strides = [1, 1]} : vector<4x128xf32> to vector<2x128xf32>
    %c0_66 = arith.constant 0 : index
    %c0_67 = arith.constant 0 : index
    %124 = vector.load %arg19[%c0_66, %c0_67] : memref<128x128xf32, #tpu.memory_space<vmem>>, vector<128x128xf32>
    %cst_68 = arith.constant dense<0.000000e+00> : vector<2x128xf32>
    %125 = tpu.matmul %122, %124, %cst_68 {dimension_numbers = #tpu.dot_dimension_numbers<[1], [0], [0], [1], [0, 0, 1, 1], [], []>} : vector<2x128xf32>, vector<128x128xf32>, vector<2x128xf32> -> vector<2x128xf32>
    %c0_69 = arith.constant 0 : index
    %c0_70 = arith.constant 0 : index
    %126 = vector.load %arg20[%c0_69, %c0_70] : memref<1x128xf32, #tpu.memory_space<vmem>>, vector<1x128xf32>
    %127 = vector.broadcast %126 : vector<1x128xf32> to vector<2x128xf32>
    %128 = arith.addf %125, %127 : vector<2x128xf32>
    %129 = arith.subf %128, %123 : vector<2x128xf32>
    %130 = arith.addf %123, %129 : vector<2x128xf32>
    %c0_71 = arith.constant 0 : index
    %c0_72 = arith.constant 0 : index
    %131 = vector.load %arg21[%c0_71, %c0_72] : memref<2x128xf32, #tpu.memory_space<vmem>>, vector<2x128xf32>
    tpu.vector_store %arg21[%c0_71, %c0_72], %130 {strides = array<i32>} : memref<2x128xf32, #tpu.memory_space<vmem>>, vector<2x128xf32>,
    return
  }
}

</mosaic_0001>

<bundles_post_ra>
// kernel: style_transfer_forward.1
= control target key start
LH: loop header
LB: loop body
LE: loop exit
PB: predicated region body
PF: predicated region fallthrough
CT: control target
= control target key end

     0   :  { %s3250_s0 = inlined_call_operand.vmem [shape: f32[4,8,128], index: 0, kind: input, shape index: {}]   ;;  %s3251_s1 = inlined_call_operand.vmem [shape: f32[4,1,8], index: 1, kind: input, shape index: {}]   ;;  %s3252_s2 = inlined_call_operand.vmem [shape: f32[4,32], index: 2, kind: input, shape index: {}]   ;;  %s3253_s3 = inlined_call_operand.vmem [shape: f32[128,128], index: 3, kind: input, shape index: {}]   ;;  %s3254_s4 = inlined_call_operand.vmem [shape: f32[1,128], index: 4, kind: input, shape index: {}]   ;;  %s3255_s5 = inlined_call_operand.vmem [shape: f32[128,128], index: 5, kind: input, shape index: {}]   ;;  %s3256_s6 = inlined_call_operand.vmem [shape: f32[1,128], index: 6, kind: input, shape index: {}]   ;;  %s3257_s7 = inlined_call_operand.vmem [shape: f32[128,128], index: 7, kind: input, shape index: {}]   ;;  %s3258_s8 = inlined_call_operand.vmem [shape: f32[1,128], index: 8, kind: input, shape index: {}]   ;;  %s3259_s9 = inlined_call_operand.vmem [shape: f32[128,128], index: 9, kind: input, shape index: {}]   ;;  %s3260_s10 = inlined_call_operand.vmem [shape: f32[1,128], index: 10, kind: input, shape index: {}]   ;;  %s3261_s11 = inlined_call_operand.vmem [shape: f32[1,128], index: 11, kind: input, shape index: {}]   ;;  %s3262_s12 = inlined_call_operand.vmem [shape: f32[1,128], index: 12, kind: input, shape index: {}]   ;;  %s3263_s13 = inlined_call_operand.hbm [shape: f32[128,128], index: 13, kind: input, shape index: {}]   ;;  %s3264_s14 = inlined_call_operand.vmem [shape: f32[1,128], index: 14, kind: input, shape index: {}]   ;;  %s3265_s15 = inlined_call_operand.hbm [shape: f32[128,128], index: 15, kind: input, shape index: {}]   ;;  %s3266_s16 = inlined_call_operand.vmem [shape: f32[1,128], index: 16, kind: input, shape index: {}]   ;;  %s3267_s17 = inlined_call_operand.vmem [shape: f32[1,128], index: 17, kind: input, shape index: {}]   ;;  %s3268_s18 = inlined_call_operand.vmem [shape: f32[1,128], index: 18, kind: input, shape index: {}]   ;;  %s3269_s19 = inlined_call_operand.hbm [shape: f32[128,128], index: 19, kind: input, shape index: {}]   ;;  %s3270_s20 = inlined_call_operand.vmem [shape: f32[1,128], index: 20, kind: input, shape index: {}]   ;;  %s3271_s21 = inlined_call_operand.hbm [shape: f32[2,128], index: 21, kind: output, shape index: {}]  }
   0x1   :  { %3276 = sst [smem:[#allocation12_spill]] %s3250_s0 }
   0x2   :  { %3277 = sst [smem:[#allocation13_spill]] %s3251_s1 }
   0x3   :  { %3278 = sst [smem:[#allocation14_spill]] %s3252_s2 }
   0x4   :  { %3279 = sst [smem:[#allocation15_spill]] %s3253_s3 }
   0x5   :  { %3280 = sst [smem:[#allocation16_spill]] %s3254_s4 }
   0x6   :  { %3281 = sst [smem:[#allocation17_spill]] %s3255_s5 }
   0x7   :  { %26 = vsyncpa [#allocation3], 0 }
   0x8   :  { %27 = vsyncpa [#allocation6], 0 }
   0x9   :  { %28 = vsyncpa [#allocation4], 0  ;;  %s2661_s2 = smov [#allocation5]   ;;  %s2662_s26 = smov [#allocation2]  }
   0xa   :  { %s74_s25 = sshll.u32 %s2661_s2, 4  ;;  %s60_s27 = sshll.u32 %s2662_s26, 4  ;;  %s75_s25 = int_to_ptr.vmem [resolvable:$true] %s74_s25  ;;  %s2780_s27 = int_to_ptr.vmem [resolvable:$true] %s60_s27 }
   0xb   :  { %s2567_s29 = scalar_lea.hbm %s3265_s15, 2048 }
   0xc   :  { %p2568_p0 = scmp.ne.s32.totalorder %s3265_s15, %s2567_s29  ;;  %p2571_p1 = scmp.lt.u32.totalorder %s2567_s29, %s3265_s15 }
   0xe   :  { %p2573_p2 = pnand %p2571_p1, %p2568_p0 }
  0x10   :  { %2576 = shalt.err (!%p2573_p2)
}
  0x11   :  { %s2577_s22 = scalar_lea.vmem %s75_s25, 2048  ;;  %p2582_p4 = scmp.lt.s32.totalorder %s75_s25, %s75_s25 }
  0x12   :  { %p2578_p3 = scmp.ne.s32.totalorder %s75_s25, %s2577_s22  ;;  %p2583_p5 = scmp.lt.s32.totalorder %s2577_s22, %s2577_s22 }
  0x14   :  { %p2584_p6 = por %p2583_p5, %p2582_p4 }
  0x16   :  { %p2585_p7 = pnand %p2584_p6, %p2578_p3 }
  0x18   :  { %2588 = shalt.err (!%p2585_p7)
}
  0x19   :  { %s2663_s23 = smov 128   ;;  %s2664_s1 = smov 8  }
  0x1a   :  { %80 = dma.hbm_to_vmem [thread:$0]  %s3265_s15, 2048, %s75_s25, [#allocation6], %s2663_s23, %s2663_s23, %s2664_s1  }
  0x1b   :  { %s2589_s28 = scalar_lea.hbm %s3263_s13, 2048 }
  0x1c   :  { %p2590_p8 = scmp.ne.s32.totalorder %s3263_s13, %s2589_s28  ;;  %p2593_p9 = scmp.lt.u32.totalorder %s2589_s28, %s3263_s13 }
  0x1e   :  { %p2595_p10 = pnand %p2593_p9, %p2590_p8 }
  0x20   :  { %2598 = shalt.err (!%p2595_p10)
}
  0x21   :  { %s2599_s5 = scalar_lea.vmem %s2780_s27, 2048  ;;  %p2604_p12 = scmp.lt.s32.totalorder %s2780_s27, %s2780_s27 }
  0x22   :  { %p2600_p11 = scmp.ne.s32.totalorder %s2780_s27, %s2599_s5  ;;  %p2605_p13 = scmp.lt.s32.totalorder %s2599_s5, %s2599_s5 }
  0x24   :  { %p2606_p0 = por %p2605_p13, %p2604_p12 }
  0x26   :  { %p2607_p1 = pnand %p2606_p0, %p2600_p11 }
  0x28   :  { %2610 = shalt.err (!%p2607_p1)
}
  0x29   :  { %66 = dma.hbm_to_vmem [thread:$0]  %s3263_s13, 2048, %s2780_s27, [#allocation3], %s2663_s23, %s2663_s23, %s2664_s1  }
  0x2a   :  { %s2665_s22 = smov [#allocation7]   ;;  %s2611_s3 = scalar_lea.hbm %s3269_s19, 2048 }
  0x2b   :  { %s92_s24 = sshll.u32 %s2665_s22, 4  ;;  %p2612_p2 = scmp.ne.s32.totalorder %s3269_s19, %s2611_s3  ;;  %s93_s24 = int_to_ptr.vmem [resolvable:$true] %s92_s24 }
  0x2c   :  { %p2615_p3 = scmp.lt.u32.totalorder %s2611_s3, %s3269_s19 }
  0x2e   :  { %p2617_p4 = pnand %p2615_p3, %p2612_p2 }
  0x30   :  { %2620 = shalt.err (!%p2617_p4)
}
  0x31   :  { %s2621_s30 = scalar_lea.vmem %s93_s24, 2048  ;;  %p2626_p6 = scmp.lt.s32.totalorder %s93_s24, %s93_s24 }
  0x32   :  { %p2622_p5 = scmp.ne.s32.totalorder %s93_s24, %s2621_s30  ;;  %p2627_p7 = scmp.lt.s32.totalorder %s2621_s30, %s2621_s30 }
  0x34   :  { %p2628_p8 = por %p2627_p7, %p2626_p6 }
  0x36   :  { %p2629_p9 = pnand %p2628_p8, %p2622_p5 }
  0x38   :  { %2632 = shalt.err (!%p2629_p9)
}
  0x39   :  { %98 = dma.hbm_to_vmem [thread:$0]  %s3269_s19, 2048, %s93_s24, [#allocation6], %s2663_s23, %s2663_s23, %s2664_s1  }
  0x3a   :  { %2655 = dma.done.wait [#allocation3], 2048  }
  0x3b   :  { %2656 = vsyncadd [#allocation3], 4294965248 }
  0x3c   :  { %2657 = dma.done.wait [#allocation6], 4096  }
  0x3d   :  { %2658 = vsyncadd [#allocation6], 4294963200  ;;  %s3282_s25 = sld [smem:[#allocation17_spill]]  ;;  %s3283_s28 = sld [smem:[#allocation15_spill]]  ;;  %v2666_v52 = vmov 0.0   ;;  %vm2667_vm0 = vmmov 0  }
  0x3e   :  { %s3284_s29 = sld [smem:[#allocation12_spill]]  ;;  %v1809_v53 = vld [vmem:[%s3256_s6] ss:$0 sm:$0xff]  ;;  %s3285_s4 = sld [smem:[#allocation16_spill]]  ;;  %vm762_vm1 = vcmask 64512   ;;  %vm1616_vm2 = vcmask 261120  }
  0x3f   :  { %s3286_s1 = sld [smem:[#allocation13_spill]]  ;;  %s3287_s13 = sld [smem:[#allocation14_spill]] }
  0x40   :  { %s2669_s15 = smov [#allocation8]  }
  0x41   :  { %s1798_s22 = sshll.u32 %s2669_s15, 4  ;;  %s1799_s22 = int_to_ptr.vmem [resolvable:$true] %s1798_s22 }
  0x42   :  { %s2633_s2 = scalar_lea.vmem %s1799_s22, 32  ;;  %p2638_p11 = scmp.lt.s32.totalorder %s1799_s22, %s1799_s22 }
  0x43   :  { %v226_v0 = vld [vmem:[%s3282_s25] sm:$0xff]  ;;  %v227_v1 = vld [vmem:[%s3282_s25 + $0x8] sm:$0xff]  ;;  %v228_v5 = vld [vmem:[%s3282_s25 + $0x10] sm:$0xff]  ;;  %p2634_p10 = scmp.ne.s32.totalorder %s1799_s22, %s2633_s2  ;;  %p2639_p12 = scmp.lt.s32.totalorder %s2633_s2, %s2633_s2 }
  0x44   :  { %v118_v2 = vld [vmem:[%s3283_s28] sm:$0xff]  ;;  %v2328_v3 = vpack.c.bf16 %v227_v1, %v226_v0  ;;  %v119_v4 = vld [vmem:[%s3283_s28 + $0x8] sm:$0xff]  ;;  %v229_v6 = vld [vmem:[%s3282_s25 + $0x18] sm:$0xff] }
  0x45   :  { %v2296_v7 = vpack.c.bf16 %v119_v4, %v118_v2  ;;  %v2332_v8 = vpack.c.bf16 %v229_v6, %v228_v5  ;;  %v120_v9 = vld [vmem:[%s3283_s28 + $0x10] sm:$0xff]  ;;  %v121_v10 = vld [vmem:[%s3283_s28 + $0x18] sm:$0xff]  ;;  %v230_v11 = vld [vmem:[%s3282_s25 + $0x20] sm:$0xff]  ;;  %p2640_p13 = por %p2639_p12, %p2638_p11 }
  0x46   :  { %2329 = vmatprep.subr.bf16.mxu1 %v2328_v3  ;;  %v2300_v12 = vpack.c.bf16 %v121_v10, %v120_v9  ;;  %v231_v13 = vld [vmem:[%s3282_s25 + $0x28] sm:$0xff]  ;;  %v122_v14 = vld [vmem:[%s3283_s28 + $0x20] sm:$0xff]  ;;  %v232_v18 = vld [vmem:[%s3282_s25 + $0x30] sm:$0xff] }
  0x47   :  { %v123_v15 = vld [vmem:[%s3283_s28 + $0x28] sm:$0xff]  ;;  %2331 = vmatpush3.bf16.msra.mxu1 %v2328_v3  ;;  %2297 = vmatprep.subr.bf16.mxu0 %v2296_v7  ;;  %v2336_v16 = vpack.c.bf16 %v231_v13, %v230_v11  ;;  %v233_v19 = vld [vmem:[%s3282_s25 + $0x38] sm:$0xff]  ;;  %v124_v20 = vld [vmem:[%s3283_s28 + $0x30] sm:$0xff]  ;;  %p2641_p0 = pnand %p2640_p13, %p2634_p10 }
  0x48   :  { %2299 = vmatpush3.bf16.msra.mxu0 %v2296_v7  ;;  %2333 = vmatprep.subr.bf16.mxu1 %v2332_v8  ;;  %v2304_v17 = vpack.c.bf16 %v123_v15, %v122_v14  ;;  %v125_v21 = vld [vmem:[%s3283_s28 + $0x38] sm:$0xff]  ;;  %v2340_v22 = vpack.c.bf16 %v233_v19, %v232_v18  ;;  %v234_v24 = vld [vmem:[%s3282_s25 + $0x40] sm:$0xff]  ;;  %v235_v25 = vld [vmem:[%s3282_s25 + $0x48] sm:$0xff] }
  0x49   :  { %2301 = vmatprep.subr.bf16.mxu0 %v2300_v12  ;;  %v2308_v23 = vpack.c.bf16 %v125_v21, %v124_v20  ;;  %v2889_v26 = vld [vmem:[%s3284_s29] sm:$0xff]  ;;  %v127_v28 = vld [vmem:[%s3283_s28 + $0x48] sm:$0xff]  ;;  %v2344_v29 = vpack.c.bf16 %v235_v25, %v234_v24  ;;  %v236_v31 = vld [vmem:[%s3282_s25 + $0x50] sm:$0xff] }
  0x4a   :  { %v126_v27 = vld [vmem:[%s3283_s28 + $0x40] sm:$0xff]  ;;  %2052 = vmatprep.mubr.f32.mxu1 %v2889_v26  ;;  %2014 = vmatprep.mubr.f32.mxu0 %v2889_v26  ;;  %v237_v32 = vld [vmem:[%s3282_s25 + $0x58] sm:$0xff]  ;;  %v128_v33 = vld [vmem:[%s3283_s28 + $0x50] sm:$0xff] }
  0x4b   :  { %2335 = vmatpush3.bf16.msra.mxu1 %v2332_v8  ;;  %v2312_v30 = vpack.c.bf16 %v127_v28, %v126_v27  ;;  %v129_v34 = vld [vmem:[%s3283_s28 + $0x58] sm:$0xff]  ;;  %v2348_v35 = vpack.c.bf16 %v237_v32, %v236_v31  ;;  %v238_v37 = vld [vmem:[%s3282_s25 + $0x60] sm:$0xff]  ;;  %v239_v38 = vld [vmem:[%s3282_s25 + $0x68] sm:$0xff]  ;;  %v738_v32 = vlaneseq }
  0x4c   :  { %2303 = vmatpush3.bf16.msra.mxu0 %v2300_v12  ;;  %2337 = vmatprep.subr.bf16.mxu1 %v2336_v16  ;;  %v2316_v36 = vpack.c.bf16 %v129_v34, %v128_v33  ;;  %v130_v39 = vld [vmem:[%s3283_s28 + $0x60] sm:$0xff]  ;;  %v131_v40 = vld [vmem:[%s3283_s28 + $0x68] sm:$0xff]  ;;  %v2352_v41 = vpack.c.bf16 %v239_v38, %v238_v37  ;;  %v240_v43 = vld [vmem:[%s3282_s25 + $0x70] sm:$0xff] }
  0x4d   :  { %2305 = vmatprep.subr.bf16.mxu0 %v2304_v17  ;;  %v2320_v42 = vpack.c.bf16 %v131_v40, %v130_v39  ;;  %v241_v44 = vld [vmem:[%s3282_s25 + $0x78] sm:$0xff]  ;;  %v132_v45 = vld [vmem:[%s3283_s28 + $0x70] sm:$0xff]  ;;  %v2938_v49 = vld [vmem:[%s3284_s29 + $0x8] sm:$0xff] }
  0x4e   :  { %v133_v46 = vld [vmem:[%s3283_s28 + $0x78] sm:$0xff]  ;;  %v2356_v47 = vpack.c.bf16 %v241_v44, %v240_v43  ;;  %v2943_v50 = vld [vmem:[%s3284_s29 + $0x10] sm:$0xff]  ;;  %v1808_v55 = vld [vmem:[%s3285_s4] ss:$0 sm:$0xff] }
  0x4f   :  { %2339 = vmatpush3.bf16.msra.mxu1 %v2336_v16  ;;  %v2324_v48 = vpack.c.bf16 %v133_v46, %v132_v45  ;;  %v2951_v51 = vld [vmem:[%s3284_s29 + $0x18] sm:$0xff]  ;;  %v334_v7 = vld [vmem:[%s3257_s7] sm:$0xff]  ;;  %v335_v8 = vld [vmem:[%s3257_s7 + $0x8] sm:$0xff] }
  0x50   :  { %2307 = vmatpush3.bf16.msra.mxu0 %v2304_v17  ;;  %2341 = vmatprep.subr.bf16.mxu1 %v2340_v22  ;;  %v336_v9 = vld [vmem:[%s3257_s7 + $0x10] sm:$0xff]  ;;  %v2360_v10 = vpack.c.bf16 %v335_v8, %v334_v7  ;;  %v337_v11 = vld [vmem:[%s3257_s7 + $0x18] sm:$0xff]  ;;  %v338_v13 = vld [vmem:[%s3257_s7 + $0x20] sm:$0xff] }
  0x51   :  { %2309 = vmatprep.subr.bf16.mxu0 %v2308_v23  ;;  %v2364_v12 = vpack.c.bf16 %v337_v11, %v336_v9  ;;  %v339_v14 = vld [vmem:[%s3257_s7 + $0x28] sm:$0xff]  ;;  %v340_v16 = vld [vmem:[%s3257_s7 + $0x30] sm:$0xff]  ;;  %v341_v17 = vld [vmem:[%s3257_s7 + $0x38] sm:$0xff] }
  0x52   :  { %v2368_v15 = vpack.c.bf16 %v339_v14, %v338_v13  ;;  %v2372_v18 = vpack.c.bf16 %v341_v17, %v340_v16  ;;  %v342_v19 = vld [vmem:[%s3257_s7 + $0x40] sm:$0xff]  ;;  %v343_v20 = vld [vmem:[%s3257_s7 + $0x48] sm:$0xff] }
  0x53   :  { %2343 = vmatpush3.bf16.msra.mxu1 %v2340_v22  ;;  %v2376_v21 = vpack.c.bf16 %v343_v20, %v342_v19  ;;  %v344_v22 = vld [vmem:[%s3257_s7 + $0x50] sm:$0xff]  ;;  %v346_v25 = vld [vmem:[%s3257_s7 + $0x60] sm:$0xff]  ;;  %v347_v27 = vld [vmem:[%s3257_s7 + $0x68] sm:$0xff] }
  0x54   :  { %2311 = vmatpush3.bf16.msra.mxu0 %v2308_v23  ;;  %2345 = vmatprep.subr.bf16.mxu1 %v2344_v29  ;;  %v345_v23 = vld [vmem:[%s3257_s7 + $0x58] sm:$0xff]  ;;  %v2384_v28 = vpack.c.bf16 %v347_v27, %v346_v25  ;;  %v114_v33 = vld [vmem:[%s3286_s1] sm:$0x1]  ;;  %v116_v40 = vld [vmem:[%s3286_s1 + $0x2] sm:$0x1] }
  0x55   :  { %2313 = vmatprep.subr.bf16.mxu0 %v2312_v30  ;;  %v2380_v24 = vpack.c.bf16 %v345_v23, %v344_v22  ;;  %v726_v34 = vsub.f32 1.0, %v114_v33  ;;  %v728_v43 = vsub.f32 1.0, %v116_v40  ;;  %v117_v45 = vld [vmem:[%s3286_s1 + $0x3] sm:$0x1]  ;;  %v1810_v33 = vld [vmem:[%s3258_s8] ss:$0 sm:$0xff] }
  0x57   :  { %2347 = vmatpush3.bf16.msra.mxu1 %v2344_v29  ;;  %v348_v29 = vld [vmem:[%s3257_s7 + $0x70] sm:$0xff]  ;;  %v730_v37 = vmul.f32 -1e+09, %v726_v34 }
  0x58   :  { %2315 = vmatpush3.bf16.msra.mxu0 %v2312_v30  ;;  %2349 = vmatprep.subr.bf16.mxu1 %v2348_v35  ;;  %v349_v30 = vld [vmem:[%s3257_s7 + $0x78] sm:$0xff] }
  0x59   :  { %2317 = vmatprep.subr.bf16.mxu0 %v2316_v36  ;;  %v2388_v31 = vpack.c.bf16 %v349_v30, %v348_v29 }
  0x5b   :  { %2351 = vmatpush3.bf16.msra.mxu1 %v2348_v35  ;;  %v739_v35 = vshrl.u32 %v738_v32, 7 }
  0x5c   :  { %2319 = vmatpush3.bf16.msra.mxu0 %v2316_v36  ;;  %2353 = vmatprep.subr.bf16.mxu1 %v2352_v41  ;;  %v115_v36 = vld [vmem:[%s3286_s1 + $0x1] sm:$0x1] }
  0x5d   :  { %2321 = vmatprep.subr.bf16.mxu0 %v2320_v42  ;;  %v740_v38 = vsub.s32 0, %v739_v35  ;;  %v727_v39 = vsub.f32 1.0, %v115_v36 }
  0x5f   :  { %2355 = vmatpush3.bf16.msra.mxu1 %v2352_v41  ;;  %v741_v41 = vrot.slane %v730_v37, %v740_v38 }
  0x60   :  { %2323 = vmatpush3.bf16.msra.mxu0 %v2320_v42  ;;  %2357 = vmatprep.subr.bf16.mxu1 %v2356_v47  ;;  %v731_v42 = vmul.f32 -1e+09, %v727_v39 }
  0x61   :  { %2325 = vmatprep.subr.bf16.mxu0 %v2324_v48 }
  0x63   :  { %2359 = vmatpush3.bf16.msra.mxu1 %v2356_v47 }
  0x64   :  { %2327 = vmatpush3.bf16.msra.mxu0 %v2324_v48  ;;  %2096 = vmatprep.subr.mxu1 %v2666_v52 }
  0x65   :  { %2361 = vmatprep.subr.bf16.mxu0 %v2360_v10 }
  0x66   :  { %2053 = vmatmul.mubr.f32.vlgmr.msra.gmra.mrb[0].mxu1 %v2938_v49 }
  0x67   :  { %2015 = vmatmul.mubr.f32.vlgmr.msra.gmra.mrb[0].mxu0 %v2938_v49  ;;  %2055 = vmatprep.mubr.f32.mxu1 %v2943_v50 }
  0x68   :  { %2017 = vmatprep.mubr.f32.mxu0 %v2943_v50  ;;  %2363 = vmatpush3.bf16.msra.mxu0 %v2360_v10 }
  0x69   :  { %2365 = vmatprep.subr.bf16.mxu0 %v2364_v12 }
  0x6a   :  { %2056 = vmatmul.mubr.f32.gmra.mrb[2].mxu1 %v2951_v51 }
  0x6b   :  { %2018 = vmatmul.mubr.f32.gmra.mrb[2].mxu0 %v2951_v51  ;;  %2098 = vmatprep.mubr.msk.f32.mxu1 %vm2667_vm0, %v2666_v52 }
  0x6c   :  { %2090 = vmatprep.mubr.f32.mxu0 %v2889_v26  ;;  %2367 = vmatpush3.bf16.msra.mxu0 %v2364_v12 }
  0x6d   :  { %2369 = vmatprep.subr.bf16.mxu0 %v2368_v15 }
  0x70   :  { %2371 = vmatpush3.bf16.msra.mxu0 %v2368_v15 }
  0x71   :  { %2373 = vmatprep.subr.bf16.mxu0 %v2372_v18 }
  0x74   :  { %2375 = vmatpush3.bf16.msra.mxu0 %v2372_v18 }
  0x75   :  { %2377 = vmatprep.subr.bf16.mxu0 %v2376_v21 }
  0x78   :  { %2379 = vmatpush3.bf16.msra.mxu0 %v2376_v21 }
  0x79   :  { %2381 = vmatprep.subr.bf16.mxu0 %v2380_v24 }
  0x7c   :  { %2383 = vmatpush3.bf16.msra.mxu0 %v2380_v24 }
  0x7d   :  { %2385 = vmatprep.subr.bf16.mxu0 %v2384_v28 }
  0x80   :  { %2387 = vmatpush3.bf16.msra.mxu0 %v2384_v28 }
  0x81   :  { %2389 = vmatprep.subr.bf16.mxu0 %v2388_v31 }
  0x84   :  { %2391 = vmatpush3.bf16.msra.mxu0 %v2388_v31 }
  0x87   :  { %2091 = vmatmul.mubr.f32.vlgmr.msra.gmra.mrb[4].mxu0 %v2938_v49 }
  0x88   :  { %2093 = vmatprep.mubr.f32.mxu0 %v2943_v50 }
  0x8b   :  { %2094 = vmatmul.mubr.f32.gmra.mrb[6].mxu0 %v2951_v51 }
 0x139   :  { %v2054_v54 = vpop.f32.mrb[0].mxu1 }
 0x13a   :  { %v315_v56 = vpop.f32.mrb[1].mxu1  ;;  %v2016_v57 = vpop.f32.mrb[0].mxu0  ;;  %v321_v0 = vadd.f32 %v2054_v54, %v1809_v53  ;;  %v732_v54 = vmul.f32 -1e+09, %v728_v43  ;;  %v1101_v43 = vld [vmem:[%s3259_s9 + $0x10] sm:$0xff] }
 0x13b   :  { %v316_v58 = vadd.f32 %v1809_v53, %v315_v56  ;;  %v207_v59 = vpop.f32.mrb[1].mxu0  ;;  %v213_v3 = vadd.f32 %v2016_v57, %v1808_v55 }
 0x13c   :  { %v208_v60 = vadd.f32 %v1808_v55, %v207_v59 }
 0x13d   :  { %2097 = vmatpush3.xpose.msra.mxu1 %v316_v58  ;;  %v2057_v61 = vpop.f32.mrb[2].mxu1 }
 0x13e   :  { %2101 = vmatprep.subr.mxu1 %v2666_v52  ;;  %v325_v62 = vpop.f32.mrb[3].mxu1  ;;  %v2019_v63 = vpop.f32.mrb[2].mxu0  ;;  %v331_v5 = vadd.f32 %v2057_v61, %v1809_v53  ;;  %v749_v61 = vrot.slane %v732_v54, %v740_v38  ;;  %v1105_v54 = vld [vmem:[%s3259_s9 + $0x30] sm:$0xff] }
 0x13f   :  { %v217_v1 = vpop.f32.mrb[3].mxu0  ;;  %v326_v2 = vadd.f32 %v1809_v53, %v325_v62  ;;  %v223_v6 = vadd.f32 %v2019_v63, %v1808_v55  ;;  %v745_v53 = vrot.slane %v731_v42, %v740_v38  ;;  %v1100_v42 = vld [vmem:[%s3259_s9 + $0x8] sm:$0xff] }
 0x140   :  { %2099 = vmatmul.mubr.f32.vlgmr.msra.gmra.mrb[4].mxu1 %v208_v60  ;;  %v218_v4 = vadd.f32 %v1808_v55, %v217_v1  ;;  %v729_v55 = vsub.f32 1.0, %v117_v45  ;;  %v1102_v45 = vld [vmem:[%s3259_s9 + $0x18] sm:$0xff] }
 0x141   :  { %2102 = vmatpush3.xpose.msra.mxu1 %v321_v0  ;;  %2103 = vmatprep.mubr.msk.f32.mxu1 %vm2667_vm0, %v2666_v52 }
 0x142   :  { %2106 = vmatprep.subr.mxu1 %v2666_v52  ;;  %v733_v62 = vmul.f32 -1e+09, %v729_v55  ;;  %v1106_v55 = vld [vmem:[%s3259_s9 + $0x38] sm:$0xff] }
 0x144   :  { %2104 = vmatmul.mubr.f32.vlgmr.msra.gmra.mrb[6].mxu1 %v213_v3 }
 0x145   :  { %2107 = vmatpush3.xpose.msra.mxu1 %v326_v2  ;;  %2108 = vmatprep.mubr.msk.f32.mxu1 %vm2667_vm0, %v2666_v52 }
 0x146   :  { %2111 = vmatprep.subr.mxu1 %v2666_v52 }
 0x148   :  { %2109 = vmatmul.mubr.f32.vlgmr.msra.gmra.mrb[8].mxu1 %v218_v4  ;;  %v753_v4 = vrot.slane %v733_v62, %v740_v38 }
 0x149   :  { %2112 = vmatpush3.xpose.msra.mxu1 %v331_v5  ;;  %2113 = vmatprep.mubr.msk.f32.mxu1 %vm2667_vm0, %v2666_v52 }
 0x14a   :  { %2116 = vmatprep.subr.mxu1 %v2666_v52 }
 0x14c   :  { %2114 = vmatmul.mubr.f32.vlgmr.msra.gmra.mrb[10].mxu1 %v223_v6 }
 0x14d   :  { %2118 = vmatprep.mubr.msk.f32.mxu1 %vm2667_vm0, %v2666_v52 }
 0x15a   :  { %v2092_v32 = vpop.f32.mrb[4].mxu0 }
 0x15b   :  { %v423_v34 = vpop.f32.mrb[5].mxu0  ;;  %v429_v35 = vadd.f32 %v2092_v32, %v1810_v33 }
 0x15c   :  { %v424_v36 = vadd.f32 %v1810_v33, %v423_v34 }
 0x15e   :  { %2117 = vmatpush3.msra.mxu1 %v424_v36  ;;  %v2095_v37 = vpop.f32.mrb[6].mxu0 }
 0x15f   :  { %2121 = vmatprep.subr.mxu1 %v2666_v52  ;;  %v433_v38 = vpop.f32.mrb[7].mxu0  ;;  %v439_v39 = vadd.f32 %v2095_v37, %v1810_v33 }
 0x160   :  { %v434_v40 = vadd.f32 %v1810_v33, %v433_v38 }
 0x213   :  { %v508_v44 = vpop.f32.mrb[4].mxu1 }
 0x214   :  { %v722_v46 = vmul.f32 0.17677669, %v508_v44  ;;  %v2100_v47 = vpop.f32.mrb[5].mxu1 }
 0x215   :  { %v1103_v47 = vld [vmem:[%s3259_s9 + $0x20] sm:$0xff] }
 0x216   :  { %v758_v48 = vadd.f32 %v741_v41, %v722_v46  ;;  %v1099_v41 = vld [vmem:[%s3259_s9] sm:$0xff]  ;;  %v2396_v46 = vpack.c.bf16 %v1102_v45, %v1101_v43  ;;  %v1288_v45 = vld [vmem:[#allocation2 + $0x18] sm:$0xff] }
 0x217   :  { %v578_v56 = vpop.f32.mrb[6].mxu1  ;;  %v2392_v44 = vpack.c.bf16 %v1100_v42, %v1099_v41 }
 0x218   :  { %v723_v57 = vmul.f32 0.17677669, %v578_v56  ;;  %v2105_v58 = vpop.f32.mrb[7].mxu1  ;;  %v763_v59 = vsel %vm762_vm1, %v758_v48, -inf  ;;  %v2404_v56 = vpack.c.bf16 %v1106_v55, %v1105_v54  ;;  %v1293_v55 = vld [vmem:[#allocation2 + $0x40] sm:$0xff] }
 0x219   :  { %764 = vmax.xlane.f32.xlu0 %v763_v59  ;;  %2393 = vmatprep.subr.bf16.mxu0 %v2392_v44  ;;  %v1108_v58 = vld [vmem:[%s3259_s9 + $0x48] sm:$0xff] }
 0x21a   :  { %v759_v60 = vadd.f32 %v745_v53, %v723_v57  ;;  %2395 = vmatpush3.bf16.msra.mxu0 %v2392_v44  ;;  %v1107_v57 = vld [vmem:[%s3259_s9 + $0x40] sm:$0xff]  ;;  %v1287_v44 = vld [vmem:[#allocation2 + $0x10] sm:$0xff] }
 0x21b   :  { %v648_v63 = vpop.f32.mrb[8].mxu1  ;;  %2397 = vmatprep.subr.bf16.mxu0 %v2396_v46  ;;  %v2408_v59 = vpack.c.bf16 %v1108_v58, %v1107_v57  ;;  %v1295_v58 = vld [vmem:[#allocation2 + $0x50] sm:$0xff] }
 0x21c   :  { %v724_v0 = vmul.f32 0.17677669, %v648_v63  ;;  %v766_v1 = vsel %vm762_vm1, %v759_v60, -inf  ;;  %v2110_v2 = vpop.f32.mrb[9].mxu1  ;;  %v1111_v63 = vld [vmem:[%s3259_s9 + $0x60] sm:$0xff] }
 0x21d   :  { %767 = vmax.xlane.f32.xlu0 %v766_v1 }
 0x21e   :  { %v760_v3 = vadd.f32 %v749_v61, %v724_v0  ;;  %2399 = vmatpush3.bf16.msra.mxu0 %v2396_v46  ;;  %v1110_v61 = vld [vmem:[%s3259_s9 + $0x58] sm:$0xff]  ;;  %v1112_v0 = vld [vmem:[%s3259_s9 + $0x68] sm:$0xff]  ;;  %v2428_v46 = vpack.c.bf16 %v1288_v45, %v1287_v44 }
 0x21f   :  { %v718_v5 = vpop.f32.mrb[10].mxu1  ;;  %v2416_v1 = vpack.c.bf16 %v1112_v0, %v1111_v63  ;;  %v1299_v63 = vld [vmem:[#allocation2 + $0x70] sm:$0xff] }
 0x220   :  { %v725_v6 = vmul.f32 0.17677669, %v718_v5  ;;  %v2115_v7 = vpop.f32.mrb[11].mxu1  ;;  %v769_v8 = vsel %vm762_vm1, %v760_v3, -inf }
 0x221   :  { %770 = vmax.xlane.f32.xlu1 %v769_v8 }
 0x222   :  { %v761_v9 = vadd.f32 %v753_v4, %v725_v6 }
 0x224   :  { %v772_v10 = vsel %vm762_vm1, %v761_v9, -inf }
 0x225   :  { %773 = vmax.xlane.f32.xlu1 %v772_v10 }
 0x2a6   :  { %v765_v11 = vpop.xlane.xlu0 %764 }
 0x2a7   :  { %v775_v12 = vsub.f32 %v758_v48, %v765_v11  ;;  %v1104_v48 = vld [vmem:[%s3259_s9 + $0x28] sm:$0xff] }
 0x2a8   :  { %v2400_v53 = vpack.c.bf16 %v1104_v48, %v1103_v47  ;;  %v1291_v48 = vld [vmem:[#allocation2 + $0x30] sm:$0xff] }
 0x2a9   :  { %v779_v13 = vmul.f32 1.442695, %v775_v12 }
 0x2aa   :  { %v768_v14 = vpop.xlane.xlu0 %767  ;;  %2401 = vmatprep.subr.bf16.mxu0 %v2400_v53 }
 0x2ab   :  { %2527 = vpow2.f32 %v779_v13  ;;  %v776_v15 = vsub.f32 %v759_v60, %v768_v14  ;;  %2403 = vmatpush3.bf16.msra.mxu0 %v2400_v53  ;;  %v1109_v60 = vld [vmem:[%s3259_s9 + $0x50] sm:$0xff]  ;;  %v1292_v53 = vld [vmem:[#allocation2 + $0x38] sm:$0xff] }
 0x2ac   :  { %2405 = vmatprep.subr.bf16.mxu0 %v2404_v56  ;;  %v2412_v62 = vpack.c.bf16 %v1110_v61, %v1109_v60  ;;  %v1113_v14 = vld [vmem:[%s3259_s9 + $0x70] sm:$0xff]  ;;  %v2436_v54 = vpack.c.bf16 %v1292_v53, %v1291_v48  ;;  %v1297_v61 = vld [vmem:[#allocation2 + $0x60] sm:$0xff] }
 0x2ad   :  { %v781_v16 = vmul.f32 1.442695, %v776_v15  ;;  %v1114_v15 = vld [vmem:[%s3259_s9 + $0x78] sm:$0xff] }
 0x2ae   :  { %v771_v17 = vpop.xlane.xlu1 %770 }
 0x2af   :  { %2529 = vpow2.f32 %v781_v16  ;;  %v777_v18 = vsub.f32 %v760_v3, %v771_v17  ;;  %2407 = vmatpush3.bf16.msra.mxu0 %v2404_v56  ;;  %v2420_v16 = vpack.c.bf16 %v1114_v15, %v1113_v14  ;;  %v1294_v56 = vld [vmem:[#allocation2 + $0x48] sm:$0xff] }
 0x2b0   :  { %2409 = vmatprep.subr.bf16.mxu0 %v2408_v59  ;;  %v2440_v57 = vpack.c.bf16 %v1294_v56, %v1293_v55 }
 0x2b1   :  { %v783_v19 = vmul.f32 1.442695, %v777_v18 }
 0x2b2   :  { %v774_v20 = vpop.xlane.xlu1 %773 }
 0x2b3   :  { %2531 = vpow2.f32 %v783_v19  ;;  %v778_v21 = vsub.f32 %v761_v9, %v774_v20  ;;  %2411 = vmatpush3.bf16.msra.mxu0 %v2408_v59  ;;  %v1296_v59 = vld [vmem:[#allocation2 + $0x58] sm:$0xff] }
 0x2b4   :  { %2413 = vmatprep.subr.bf16.mxu0 %v2412_v62  ;;  %v2444_v60 = vpack.c.bf16 %v1296_v59, %v1295_v58  ;;  %v1432_v58 = vld [vmem:[#allocation5 + $0x18] sm:$0xff] }
 0x2b5   :  { %v3045_v22 = vpop.eup %2527  ;;  %v785_v23 = vmul.f32 1.442695, %v778_v21 }
 0x2b6   :  { %v787_v24 = vsel %vm762_vm1, %v3045_v22, 0.0 }
 0x2b7   :  { %2533 = vpow2.f32 %v785_v23  ;;  %788 = vadd.xlane.f32.xlu0 %v787_v24  ;;  %2415 = vmatpush3.bf16.msra.mxu0 %v2412_v62  ;;  %v1298_v62 = vld [vmem:[#allocation2 + $0x68] sm:$0xff] }
 0x2b8   :  { %2417 = vmatprep.subr.bf16.mxu0 %v2416_v1  ;;  %v2448_v0 = vpack.c.bf16 %v1298_v62, %v1297_v61  ;;  %v1434_v61 = vld [vmem:[#allocation5 + $0x28] sm:$0xff] }
 0x2b9   :  { %v3049_v25 = vpop.eup %2529 }
 0x2ba   :  { %v790_v27 = vsel %vm762_vm1, %v3049_v25, 0.0 }
 0x2bb   :  { %791 = vadd.xlane.f32.xlu1 %v790_v27  ;;  %2419 = vmatpush3.bf16.msra.mxu0 %v2416_v1  ;;  %v1286_v27 = vld [vmem:[#allocation2 + $0x8] sm:$0xff]  ;;  %v1300_v1 = vld [vmem:[#allocation2 + $0x78] sm:$0xff] }
 0x2bc   :  { %2421 = vmatprep.subr.bf16.mxu0 %v2420_v16 }
 0x2bd   :  { %v3053_v28 = vpop.eup %2531 }
 0x2be   :  { %v793_v29 = vsel %vm762_vm1, %v3053_v28, 0.0 }
 0x2bf   :  { %794 = vadd.xlane.f32.xlu0 %v793_v29  ;;  %2423 = vmatpush3.bf16.msra.mxu0 %v2420_v16  ;;  %v1815_v29 = vld [vmem:[%s3260_s10] ss:$0 sm:$0xff] }
 0x2c1   :  { %v3057_v30 = vpop.eup %2533 }
 0x2c2   :  { %v796_v31 = vsel %vm762_vm1, %v3057_v30, 0.0 }
 0x2c3   :  { %797 = vadd.xlane.f32.xlu1 %v796_v31 }
 0x344   :  { %v789_v2 = vpop.xlane.xlu0 %788 }
 0x345   :  { %2535 = vrcp.f32 %v789_v2  ;;  %v2452_v2 = vpack.c.bf16 %v1300_v1, %v1299_v63  ;;  %v1435_v63 = vld [vmem:[#allocation5 + $0x30] sm:$0xff] }
 0x348   :  { %v792_v3 = vpop.xlane.xlu1 %791 }
 0x349   :  { %2537 = vrcp.f32 %v792_v3 }
 0x34c   :  { %v795_v4 = vpop.xlane.xlu0 %794 }
 0x34d   :  { %2539 = vrcp.f32 %v795_v4 }
 0x34f   :  { %v2536_v5 = vpop.eup %2535 }
 0x350   :  { %v803_v6 = vmul.f32 %v2536_v5, %v3045_v22  ;;  %v798_v7 = vpop.xlane.xlu1 %797 }
 0x351   :  { %2541 = vrcp.f32 %v798_v7 }
 0x352   :  { %2119 = vmatmul.mubr.msk.f32.vlgmr.msra.gmra.mrb[12].mxu1 %vm762_vm1, %v803_v6 }
 0x353   :  { %v2538_v8 = vpop.eup %2537  ;;  %2122 = vmatpush3.msra.mxu1 %v429_v35  ;;  %2123 = vmatprep.mubr.msk.f32.mxu1 %vm2667_vm0, %v2666_v52 }
 0x354   :  { %v804_v9 = vmul.f32 %v2538_v8, %v3049_v25  ;;  %2126 = vmatprep.subr.mxu1 %v2666_v52  ;;  %v1285_v25 = vld [vmem:[#allocation2] sm:$0xff] }
 0x356   :  { %2124 = vmatmul.mubr.msk.f32.vlgmr.msra.gmra.mrb[14].mxu1 %vm762_vm1, %v804_v9 }
 0x357   :  { %v2540_v10 = vpop.eup %2539  ;;  %2127 = vmatpush3.msra.mxu1 %v434_v40  ;;  %2128 = vmatprep.mubr.msk.f32.mxu1 %vm2667_vm0, %v2666_v52 }
 0x358   :  { %v805_v11 = vmul.f32 %v2540_v10, %v3053_v28  ;;  %2131 = vmatprep.subr.mxu1 %v2666_v52  ;;  %v2424_v28 = vpack.c.bf16 %v1286_v27, %v1285_v25 }
 0x35a   :  { %2129 = vmatmul.mubr.msk.f32.vlgmr.msra.gmra.mrb[16].mxu1 %vm762_vm1, %v805_v11 }
 0x35b   :  { %v2542_v12 = vpop.eup %2541  ;;  %2132 = vmatpush3.msra.mxu1 %v439_v39  ;;  %2133 = vmatprep.mubr.msk.f32.mxu1 %vm2667_vm0, %v2666_v52 }
 0x35c   :  { %v806_v13 = vmul.f32 %v2542_v12, %v3057_v30  ;;  %2425 = vmatprep.subr.bf16.mxu1 %v2424_v28 }
 0x35e   :  { %2134 = vmatmul.mubr.msk.f32.vlgmr.msra.gmra.mrb[18].mxu1 %vm762_vm1, %v806_v13 }
 0x35f   :  { %2427 = vmatpush3.bf16.msra.mxu1 %v2424_v28 }
 0x360   :  { %2429 = vmatprep.subr.bf16.mxu1 %v2428_v46 }
 0x363   :  { %2431 = vmatpush3.bf16.msra.mxu1 %v2428_v46 }
 0x425   :  { %v876_v17 = vpop.f32.mrb[12].mxu1 }
 0x426   :  { %v2120_v18 = vpop.f32.mrb[13].mxu1  ;;  %2168 = vmatprep.mubr.f32.mxu0 %v876_v17 }
 0x429   :  { %v949_v19 = vpop.f32.mrb[14].mxu1 }
 0x42a   :  { %v2125_v20 = vpop.f32.mrb[15].mxu1  ;;  %2169 = vmatmul.mubr.f32.vlgmr.msra.gmra.mrb[8].mxu0 %v949_v19 }
 0x42d   :  { %v1022_v21 = vpop.f32.mrb[16].mxu1 }
 0x42e   :  { %v2130_v22 = vpop.f32.mrb[17].mxu1  ;;  %2171 = vmatprep.mubr.f32.mxu0 %v1022_v21 }
 0x431   :  { %v1095_v23 = vpop.f32.mrb[18].mxu1 }
 0x432   :  { %v2135_v24 = vpop.f32.mrb[19].mxu1  ;;  %2172 = vmatmul.mubr.f32.gmra.mrb[10].mxu0 %v1095_v23 }
 0x4fd   :  { %v2170_v30 = vpop.f32.mrb[8].mxu0 }
 0x4fe   :  { %v1194_v31 = vadd.f32 %v2170_v30, %v1815_v29  ;;  %v1188_v32 = vpop.f32.mrb[9].mxu0 }
 0x4ff   :  { %v1189_v33 = vadd.f32 %v1815_v29, %v1188_v32 }
 0x500   :  { %v3133_v34 = vadd.f32 %v1194_v31, %v2938_v49 }
 0x501   :  { %v3136_v35 = vadd.f32 %v1189_v33, %v2889_v26 }
 0x502   :  { %1215 = vadd.xlane.f32.xlu1 %v3133_v34  ;;  %v1226_v36 = vmul.f32 %v3133_v34, %v3133_v34 }
 0x503   :  { %1213 = vadd.xlane.f32.xlu0 %v3136_v35  ;;  %v1225_v38 = vmul.f32 %v3136_v35, %v3136_v35 }
 0x505   :  { %v2173_v37 = vpop.f32.mrb[10].mxu0 }
 0x506   :  { %v1204_v39 = vadd.f32 %v2173_v37, %v1815_v29  ;;  %1231 = vadd.xlane.f32.xlu1 %v1226_v36  ;;  %v1198_v40 = vpop.f32.mrb[11].mxu0  ;;  %v1816_v37 = vld [vmem:[%s3261_s11] ss:$0 sm:$0xff] }
 0x507   :  { %v1199_v41 = vadd.f32 %v1815_v29, %v1198_v40  ;;  %1229 = vadd.xlane.f32.xlu0 %v1225_v38 }
 0x508   :  { %v3145_v49 = vadd.f32 %v1204_v39, %v2951_v51  ;;  %v1289_v51 = vld [vmem:[#allocation2 + $0x20] sm:$0xff] }
 0x509   :  { %v3148_v26 = vadd.f32 %v1199_v41, %v2943_v50  ;;  %v1290_v50 = vld [vmem:[#allocation2 + $0x28] sm:$0xff]  ;;  %v1817_v41 = vld [vmem:[%s3262_s12] ss:$0 sm:$0xff] }
 0x50a   :  { %1219 = vadd.xlane.f32.xlu1 %v3145_v49  ;;  %v1228_v42 = vmul.f32 %v3145_v49, %v3145_v49  ;;  %v2432_v47 = vpack.c.bf16 %v1290_v50, %v1289_v51 }
 0x50b   :  { %1217 = vadd.xlane.f32.xlu0 %v3148_v26  ;;  %v1227_v43 = vmul.f32 %v3148_v26, %v3148_v26 }
 0x50c   :  { %2433 = vmatprep.subr.bf16.mxu1 %v2432_v47 }
 0x50d   :  { %2435 = vmatpush3.bf16.msra.mxu1 %v2432_v47 }
 0x50e   :  { %1235 = vadd.xlane.f32.xlu1 %v1228_v42  ;;  %2437 = vmatprep.subr.bf16.mxu1 %v2436_v54 }
 0x50f   :  { %1233 = vadd.xlane.f32.xlu0 %v1227_v43 }
 0x511   :  { %2439 = vmatpush3.bf16.msra.mxu1 %v2436_v54 }
 0x512   :  { %2441 = vmatprep.subr.bf16.mxu1 %v2440_v57 }
 0x515   :  { %2443 = vmatpush3.bf16.msra.mxu1 %v2440_v57  ;;  %v1431_v57 = vld [vmem:[#allocation5 + $0x10] sm:$0xff] }
 0x516   :  { %2445 = vmatprep.subr.bf16.mxu1 %v2444_v60  ;;  %v2460_v59 = vpack.c.bf16 %v1432_v58, %v1431_v57 }
 0x519   :  { %2447 = vmatpush3.bf16.msra.mxu1 %v2444_v60  ;;  %v1433_v60 = vld [vmem:[#allocation5 + $0x20] sm:$0xff] }
 0x51a   :  { %2449 = vmatprep.subr.bf16.mxu1 %v2448_v0  ;;  %v2464_v62 = vpack.c.bf16 %v1434_v61, %v1433_v60 }
 0x51d   :  { %2451 = vmatpush3.bf16.msra.mxu1 %v2448_v0  ;;  %v1436_v0 = vld [vmem:[#allocation5 + $0x38] sm:$0xff] }
 0x51e   :  { %2453 = vmatprep.subr.bf16.mxu1 %v2452_v2  ;;  %v2468_v1 = vpack.c.bf16 %v1436_v0, %v1435_v63  ;;  %v1819_v0 = vld [vmem:[%s3266_s16] ss:$0 sm:$0xff] }
 0x521   :  { %2455 = vmatpush3.bf16.msra.mxu1 %v2452_v2  ;;  %v1437_v2 = vld [vmem:[#allocation5 + $0x40] sm:$0xff] }
 0x58f   :  { %v1216_v3 = vpop.xlane.xlu1 %1215 }
 0x590   :  { %v1222_v4 = vmul.f32 0.03125, %v1216_v3  ;;  %v1214_v5 = vpop.xlane.xlu0 %1213  ;;  %v1438_v3 = vld [vmem:[#allocation5 + $0x48] sm:$0xff] }
 0x591   :  { %v1221_v6 = vmul.f32 0.03125, %v1214_v5  ;;  %v1439_v5 = vld [vmem:[#allocation5 + $0x50] sm:$0xff] }
 0x592   :  { %v1242_v8 = vmul.f32 %v1222_v4, %v1222_v4  ;;  %v1250_v32 = vsub.f32 %v3133_v34, %v1222_v4  ;;  %v2472_v4 = vpack.c.bf16 %v1438_v3, %v1437_v2 }
 0x593   :  { %v1232_v7 = vpop.xlane.xlu1 %1231  ;;  %v1241_v11 = vmul.f32 %v1221_v6, %v1221_v6  ;;  %v1249_v36 = vsub.f32 %v3136_v35, %v1221_v6  ;;  %v1440_v6 = vld [vmem:[#allocation5 + $0x58] sm:$0xff] }
 0x594   :  { %v1238_v9 = vmul.f32 0.03125, %v1232_v7  ;;  %v1230_v10 = vpop.xlane.xlu0 %1229  ;;  %v2476_v7 = vpack.c.bf16 %v1440_v6, %v1439_v5 }
 0x595   :  { %v1237_v12 = vmul.f32 0.03125, %v1230_v10 }
 0x596   :  { %v1246_v13 = vsub.f32 %v1238_v9, %v1242_v8  ;;  %v1441_v8 = vld [vmem:[#allocation5 + $0x60] sm:$0xff]  ;;  %v1442_v9 = vld [vmem:[#allocation5 + $0x68] sm:$0xff] }
 0x597   :  { %v1245_v14 = vsub.f32 %v1237_v12, %v1241_v11  ;;  %v1220_v15 = vpop.xlane.xlu1 %1219  ;;  %v2480_v10 = vpack.c.bf16 %v1442_v9, %v1441_v8  ;;  %v1443_v11 = vld [vmem:[#allocation5 + $0x70] sm:$0xff]  ;;  %v1444_v12 = vld [vmem:[#allocation5 + $0x78] sm:$0xff] }
 0x598   :  { %v1254_v16 = vadd.f32 1e-12, %v1246_v13  ;;  %v1224_v17 = vmul.f32 0.03125, %v1220_v15  ;;  %v1218_v18 = vpop.xlane.xlu0 %1217  ;;  %v2484_v13 = vpack.c.bf16 %v1444_v12, %v1443_v11 }
 0x599   :  { %v1253_v19 = vadd.f32 1e-12, %v1245_v14  ;;  %v1223_v20 = vmul.f32 0.03125, %v1218_v18  ;;  %v1818_v14 = vld [vmem:[%s3264_s14] ss:$0 sm:$0xff] }
 0x59a   :  { %2543 = vrsqrt.f32 %v1254_v16  ;;  %v1244_v22 = vmul.f32 %v1224_v17, %v1224_v17  ;;  %v1252_v34 = vsub.f32 %v3145_v49, %v1224_v17  ;;  %v1429_v49 = vld [vmem:[#allocation5] sm:$0xff] }
 0x59b   :  { %2545 = vrsqrt.f32 %v1253_v19  ;;  %v1236_v21 = vpop.xlane.xlu1 %1235  ;;  %v1243_v25 = vmul.f32 %v1223_v20, %v1223_v20  ;;  %v1251_v46 = vsub.f32 %v3148_v26, %v1223_v20  ;;  %v1430_v26 = vld [vmem:[#allocation5 + $0x8] sm:$0xff] }
 0x59c   :  { %v1240_v23 = vmul.f32 0.03125, %v1236_v21  ;;  %v1234_v24 = vpop.xlane.xlu0 %1233  ;;  %v2456_v56 = vpack.c.bf16 %v1430_v26, %v1429_v49 }
 0x59d   :  { %v1239_v27 = vmul.f32 0.03125, %v1234_v24 }
 0x59e   :  { %v1248_v28 = vsub.f32 %v1240_v23, %v1244_v22  ;;  %2457 = vmatprep.subr.bf16.mxu0 %v2456_v56 }
 0x59f   :  { %v1247_v29 = vsub.f32 %v1239_v27, %v1243_v25  ;;  %2459 = vmatpush3.bf16.msra.mxu0 %v2456_v56 }
 0x5a0   :  { %v1256_v30 = vadd.f32 1e-12, %v1248_v28  ;;  %2461 = vmatprep.subr.bf16.mxu0 %v2460_v59 }
 0x5a1   :  { %v1255_v31 = vadd.f32 1e-12, %v1247_v29 }
 0x5a2   :  { %2547 = vrsqrt.f32 %v1256_v30 }
 0x5a3   :  { %2549 = vrsqrt.f32 %v1255_v31  ;;  %2463 = vmatpush3.bf16.msra.mxu0 %v2460_v59 }
 0x5a4   :  { %v2544_v33 = vpop.eup %2543  ;;  %2465 = vmatprep.subr.bf16.mxu0 %v2464_v62 }
 0x5a5   :  { %v2546_v38 = vpop.eup %2545  ;;  %v1262_v39 = vmul.f32 %v2544_v33, %v1250_v32 }
 0x5a6   :  { %v1261_v40 = vmul.f32 %v2546_v38, %v1249_v36 }
 0x5a7   :  { %v1272_v42 = vmul.f32 %v1816_v37, %v1262_v39  ;;  %2467 = vmatpush3.bf16.msra.mxu0 %v2464_v62 }
 0x5a8   :  { %v1271_v43 = vmul.f32 %v1816_v37, %v1261_v40  ;;  %2469 = vmatprep.subr.bf16.mxu0 %v2468_v1 }
 0x5a9   :  { %v3167_v45 = vadd.f32 %v1817_v41, %v1272_v42 }
 0x5aa   :  { %v3164_v44 = vadd.f32 %v1817_v41, %v1271_v43 }
 0x5ab   :  { %2471 = vmatpush3.bf16.msra.mxu0 %v2468_v1 }
 0x5ac   :  { %v2548_v35 = vpop.eup %2547  ;;  %2206 = vmatprep.mubr.f32.mxu1 %v3164_v44  ;;  %2473 = vmatprep.subr.bf16.mxu0 %v2472_v4 }
 0x5ad   :  { %v2550_v51 = vpop.eup %2549  ;;  %2207 = vmatmul.mubr.f32.vlgmr.msra.gmra.mrb[20].mxu1 %v3167_v45  ;;  %v1264_v50 = vmul.f32 %v2548_v35, %v1252_v34 }
 0x5ae   :  { %v1263_v47 = vmul.f32 %v2550_v51, %v1251_v46 }
 0x5af   :  { %v1274_v48 = vmul.f32 %v1816_v37, %v1264_v50  ;;  %2475 = vmatpush3.bf16.msra.mxu0 %v2472_v4 }
 0x5b0   :  { %v1273_v53 = vmul.f32 %v1816_v37, %v1263_v47  ;;  %2477 = vmatprep.subr.bf16.mxu0 %v2476_v7 }
 0x5b1   :  { %v3174_v55 = vadd.f32 %v1817_v41, %v1274_v48 }
 0x5b2   :  { %v3172_v54 = vadd.f32 %v1817_v41, %v1273_v53 }
 0x5b3   :  { %2479 = vmatpush3.bf16.msra.mxu0 %v2476_v7 }
 0x5b4   :  { %2209 = vmatprep.mubr.f32.mxu1 %v3172_v54  ;;  %2481 = vmatprep.subr.bf16.mxu0 %v2480_v10 }
 0x5b5   :  { %2210 = vmatmul.mubr.f32.gmra.mrb[22].mxu1 %v3174_v55 }
 0x5b6   :  { %2293 = vmatprep.mubr.msk.f32.mxu1 %vm2667_vm0, %v2666_v52 }
 0x5b7   :  { %2483 = vmatpush3.bf16.msra.mxu0 %v2480_v10 }
 0x5b8   :  { %2485 = vmatprep.subr.bf16.mxu0 %v2484_v13 }
 0x5bb   :  { %2487 = vmatpush3.bf16.msra.mxu0 %v2484_v13 }
 0x680   :  { %v2208_v15 = vpop.f32.mrb[20].mxu1 }
 0x681   :  { %v1380_v16 = vadd.f32 %v2208_v15, %v1818_v14  ;;  %v1374_v17 = vpop.f32.mrb[21].mxu1  ;;  %v1692_v15 = vld [vmem:[#allocation7 + $0x10] sm:$0xff] }
 0x682   :  { %v1375_v18 = vadd.f32 %v1818_v14, %v1374_v17  ;;  %v1693_v17 = vld [vmem:[#allocation7 + $0x18] sm:$0xff] }
 0x683   :  { %v1394_v19 = vmul.f32 %v1380_v16, %v1380_v16 }
 0x684   :  { %v1393_v20 = vmul.f32 %v1375_v18, %v1375_v18 }
 0x685   :  { %v1398_v21 = vmul.f32 %v1394_v19, %v1380_v16  ;;  %v1694_v19 = vld [vmem:[#allocation7 + $0x20] sm:$0xff] }
 0x686   :  { %v1397_v22 = vmul.f32 %v1393_v20, %v1375_v18  ;;  %v1695_v20 = vld [vmem:[#allocation7 + $0x28] sm:$0xff] }
 0x687   :  { %v1402_v23 = vmul.f32 0.044715, %v1398_v21  ;;  %v2501_v21 = vpack.c.bf16 %v1695_v20, %v1694_v19 }
 0x688   :  { %v1401_v24 = vmul.f32 0.044715, %v1397_v22  ;;  %v2211_v25 = vpop.f32.mrb[22].mxu1  ;;  %v1696_v22 = vld [vmem:[#allocation7 + $0x30] sm:$0xff] }
 0x689   :  { %v1406_v27 = vadd.f32 %v1402_v23, %v1380_v16  ;;  %v1390_v28 = vadd.f32 %v2211_v25, %v1818_v14  ;;  %v1384_v29 = vpop.f32.mrb[23].mxu1  ;;  %v1697_v23 = vld [vmem:[#allocation7 + $0x38] sm:$0xff]  ;;  %v1698_v25 = vld [vmem:[#allocation7 + $0x40] sm:$0xff] }
 0x68a   :  { %v1405_v30 = vadd.f32 %v1401_v24, %v1375_v18  ;;  %v1385_v31 = vadd.f32 %v1818_v14, %v1384_v29  ;;  %v2668_v14 = vmov 0.0|0.0   ;;  %v2504_v24 = vpack.c.bf16 %v1697_v23, %v1696_v22  ;;  %v1700_v29 = vld [vmem:[#allocation7 + $0x50] sm:$0xff] }
 0x68b   :  { %v1410_v32 = vmul.f32 0.7978846, %v1406_v27  ;;  %v1396_v33 = vmul.f32 %v1390_v28, %v1390_v28  ;;  %2488 = vmatprep.subr.bf16.mxu0 %v2668_v14  ;;  %2494 = vmatprep.subr.bf16.mxu1 %v2668_v14  ;;  %v1699_v27 = vld [vmem:[#allocation7 + $0x48] sm:$0xff] }
 0x68c   :  { %v1409_v36 = vmul.f32 0.7978846, %v1405_v30  ;;  %v1395_v37 = vmul.f32 %v1385_v31, %v1385_v31  ;;  %v1701_v30 = vld [vmem:[#allocation7 + $0x58] sm:$0xff] }
 0x68d   :  { %2551 = vtanh.f32 %v1410_v32  ;;  %v1400_v38 = vmul.f32 %v1396_v33, %v1390_v28  ;;  %v1702_v32 = vld [vmem:[#allocation7 + $0x60] sm:$0xff]  ;;  %v1703_v33 = vld [vmem:[#allocation7 + $0x68] sm:$0xff] }
 0x68e   :  { %v1399_v39 = vmul.f32 %v1395_v37, %v1385_v31  ;;  %2553 = vtanh.f32 %v1409_v36  ;;  %v2513_v36 = vpack.c.bf16 %v1703_v33, %v1702_v32  ;;  %v1704_v37 = vld [vmem:[#allocation7 + $0x70] sm:$0xff] }
 0x68f   :  { %v1404_v40 = vmul.f32 0.044715, %v1400_v38  ;;  %v1705_v38 = vld [vmem:[#allocation7 + $0x78] sm:$0xff] }
 0x690   :  { %v1403_v41 = vmul.f32 0.044715, %v1399_v39  ;;  %v2516_v39 = vpack.c.bf16 %v1705_v38, %v1704_v37 }
 0x691   :  { %v1408_v42 = vadd.f32 %v1404_v40, %v1390_v28 }
 0x692   :  { %v1407_v43 = vadd.f32 %v1403_v41, %v1385_v31 }
 0x693   :  { %v1412_v34 = vmul.f32 0.7978846, %v1408_v42 }
 0x694   :  { %v1411_v35 = vmul.f32 0.7978846, %v1407_v43 }
 0x695   :  { %2555 = vtanh.f32 %v1412_v34 }
 0x696   :  { %2557 = vtanh.f32 %v1411_v35 }
 0x697   :  { %v2552_v46 = vpop.eup %2551 }
 0x698   :  { %v2554_v51 = vpop.eup %2553  ;;  %v1418_v50 = vadd.f32 1.0, %v2552_v46 }
 0x699   :  { %v1417_v47 = vadd.f32 1.0, %v2554_v51 }
 0x69a   :  { %v1422_v48 = vmul.f32 0.5, %v1418_v50 }
 0x69b   :  { %v1421_v53 = vmul.f32 0.5, %v1417_v47 }
 0x69c   :  { %v1426_v26 = vmul.f32 %v1422_v48, %v1380_v16 }
 0x69d   :  { %v1425_v49 = vmul.f32 %v1421_v53, %v1375_v18  ;;  %v2498_v18 = vpack.c.bf16 %v1693_v17, %v1692_v15 }
 0x69f   :  { %v2556_v56 = vpop.eup %2555  ;;  %2244 = vmatprep.mubr.f32.mxu0 %v1425_v49 }
 0x6a0   :  { %v2558_v57 = vpop.eup %2557  ;;  %2245 = vmatmul.mubr.f32.vlgmr.msra.gmra.mrb[12].mxu0 %v1426_v26  ;;  %v1420_v58 = vadd.f32 1.0, %v2556_v56 }
 0x6a1   :  { %v1419_v59 = vadd.f32 1.0, %v2558_v57 }
 0x6a2   :  { %v1424_v60 = vmul.f32 0.5, %v1420_v58 }
 0x6a3   :  { %v1423_v61 = vmul.f32 0.5, %v1419_v59 }
 0x6a4   :  { %v1428_v63 = vmul.f32 %v1424_v60, %v1390_v28  ;;  %v2507_v28 = vpack.c.bf16 %v1699_v27, %v1698_v25 }
 0x6a5   :  { %v1427_v62 = vmul.f32 %v1423_v61, %v1385_v31  ;;  %v2510_v31 = vpack.c.bf16 %v1701_v30, %v1700_v29  ;;  %v1823_v30 = vld [vmem:[%s3270_s20] ss:$0 sm:$0xff] }
 0x6a7   :  { %2247 = vmatprep.mubr.f32.mxu0 %v1427_v62 }
 0x6a8   :  { %2248 = vmatmul.mubr.f32.gmra.mrb[14].mxu0 %v1428_v63 }
 0x6a9   :  { %2258 = vmatprep.mubr.msk.f32.mxu0 %vm2667_vm0, %v2666_v52 }
 0x773   :  { %v2246_v1 = vpop.f32.mrb[12].mxu0 }
 0x774   :  { %v1524_v2 = vadd.f32 %v2246_v1, %v1819_v0  ;;  %v1518_v3 = vpop.f32.mrb[13].mxu0 }
 0x775   :  { %v1519_v4 = vadd.f32 %v1819_v0, %v1518_v3 }
 0x776   :  { %v3189_v5 = vadd.f32 %v1524_v2, %v3167_v45 }
 0x777   :  { %v3192_v6 = vadd.f32 %v1519_v4, %v3164_v44 }
 0x778   :  { %1545 = vadd.xlane.f32.xlu1 %v3189_v5  ;;  %v1556_v52 = vmul.f32 %v3189_v5, %v3189_v5 }
 0x779   :  { %1543 = vadd.xlane.f32.xlu0 %v3192_v6  ;;  %v1555_v8 = vmul.f32 %v3192_v6, %v3192_v6 }
 0x77b   :  { %v2249_v7 = vpop.f32.mrb[14].mxu0 }
 0x77c   :  { %v1534_v9 = vadd.f32 %v2249_v7, %v1819_v0  ;;  %1561 = vadd.xlane.f32.xlu1 %v1556_v52  ;;  %v1528_v10 = vpop.f32.mrb[15].mxu0 }
 0x77d   :  { %v1529_v11 = vadd.f32 %v1819_v0, %v1528_v10  ;;  %1559 = vadd.xlane.f32.xlu0 %v1555_v8  ;;  %v1820_v10 = vld [vmem:[%s3267_s17] ss:$0 sm:$0xff] }
 0x77e   :  { %v3201_v45 = vadd.f32 %v1534_v9, %v3174_v55  ;;  %v1690_v55 = vld [vmem:[#allocation7] sm:$0xff] }
 0x77f   :  { %v3204_v44 = vadd.f32 %v1529_v11, %v3172_v54  ;;  %v1691_v54 = vld [vmem:[#allocation7 + $0x8] sm:$0xff] }
 0x780   :  { %1549 = vadd.xlane.f32.xlu1 %v3201_v45  ;;  %v1558_v12 = vmul.f32 %v3201_v45, %v3201_v45  ;;  %v2495_v16 = vpack.c.bf16 %v1691_v54, %v1690_v55 }
 0x781   :  { %1547 = vadd.xlane.f32.xlu0 %v3204_v44  ;;  %v1557_v13 = vmul.f32 %v3204_v44, %v3204_v44 }
 0x782   :  { %2496 = vmatpush3.bf16.msra.mxu1 %v2495_v16 }
 0x783   :  { %2497 = vmatprep.subr.bf16.mxu1 %v2668_v14 }
 0x784   :  { %1565 = vadd.xlane.f32.xlu1 %v1558_v12 }
 0x785   :  { %1563 = vadd.xlane.f32.xlu0 %v1557_v13  ;;  %v1821_v13 = vld [vmem:[%s3268_s18] ss:$0 sm:$0xff] }
 0x786   :  { %2499 = vmatpush3.bf16.msra.mxu1 %v2498_v18 }
 0x787   :  { %2500 = vmatprep.subr.bf16.mxu1 %v2668_v14 }
 0x78a   :  { %2502 = vmatpush3.bf16.msra.mxu1 %v2501_v21 }
 0x78b   :  { %2503 = vmatprep.subr.bf16.mxu1 %v2668_v14 }
 0x78e   :  { %2505 = vmatpush3.bf16.msra.mxu1 %v2504_v24 }
 0x78f   :  { %2506 = vmatprep.subr.bf16.mxu1 %v2668_v14 }
 0x792   :  { %2508 = vmatpush3.bf16.msra.mxu1 %v2507_v28 }
 0x793   :  { %2509 = vmatprep.subr.bf16.mxu1 %v2668_v14 }
 0x796   :  { %2511 = vmatpush3.bf16.msra.mxu1 %v2510_v31 }
 0x797   :  { %2512 = vmatprep.subr.bf16.mxu1 %v2668_v14 }
 0x79a   :  { %2514 = vmatpush3.bf16.msra.mxu1 %v2513_v36 }
 0x79b   :  { %2515 = vmatprep.subr.bf16.mxu1 %v2668_v14 }
 0x79e   :  { %2517 = vmatpush3.bf16.msra.mxu1 %v2516_v39 }
 0x805   :  { %v1546_v40 = vpop.xlane.xlu1 %1545 }
 0x806   :  { %v1552_v41 = vmul.f32 0.03125, %v1546_v40  ;;  %v1544_v42 = vpop.xlane.xlu0 %1543 }
 0x807   :  { %v1551_v43 = vmul.f32 0.03125, %v1544_v42 }
 0x808   :  { %v1572_v35 = vmul.f32 %v1552_v41, %v1552_v41  ;;  %v1580_v7 = vsub.f32 %v3189_v5, %v1552_v41 }
 0x809   :  { %v1562_v34 = vpop.xlane.xlu1 %1561  ;;  %v1571_v50 = vmul.f32 %v1551_v43, %v1551_v43  ;;  %v1579_v9 = vsub.f32 %v3192_v6, %v1551_v43 }
 0x80a   :  { %v1568_v46 = vmul.f32 0.03125, %v1562_v34  ;;  %v1560_v51 = vpop.xlane.xlu0 %1559 }
 0x80b   :  { %v1567_v47 = vmul.f32 0.03125, %v1560_v51 }
 0x80c   :  { %v1576_v48 = vsub.f32 %v1568_v46, %v1572_v35 }
 0x80d   :  { %v1575_v53 = vsub.f32 %v1567_v47, %v1571_v50  ;;  %v1550_v49 = vpop.xlane.xlu1 %1549 }
 0x80e   :  { %v1584_v26 = vadd.f32 1e-12, %v1576_v48  ;;  %v1554_v56 = vmul.f32 0.03125, %v1550_v49  ;;  %v1548_v57 = vpop.xlane.xlu0 %1547 }
 0x80f   :  { %v1583_v58 = vadd.f32 1e-12, %v1575_v53  ;;  %v1553_v59 = vmul.f32 0.03125, %v1548_v57 }
 0x810   :  { %2559 = vrsqrt.f32 %v1584_v26  ;;  %v1574_v61 = vmul.f32 %v1554_v56, %v1554_v56  ;;  %v1582_v5 = vsub.f32 %v3201_v45, %v1554_v56  ;;  %v1615_v45 = vld [vmem:[%s3287_s13] sm:$0xf] }
 0x811   :  { %2561 = vrsqrt.f32 %v1583_v58  ;;  %v1566_v60 = vpop.xlane.xlu1 %1565  ;;  %v1573_v0 = vmul.f32 %v1553_v59, %v1553_v59  ;;  %v1581_v6 = vsub.f32 %v3204_v44, %v1553_v59 }
 0x812   :  { %v1570_v62 = vmul.f32 0.03125, %v1566_v60  ;;  %v1564_v63 = vpop.xlane.xlu0 %1563 }
 0x813   :  { %v1569_v1 = vmul.f32 0.03125, %v1564_v63 }
 0x814   :  { %v1578_v2 = vsub.f32 %v1570_v62, %v1574_v61 }
 0x815   :  { %v1577_v3 = vsub.f32 %v1569_v1, %v1573_v0 }
 0x816   :  { %v1586_v4 = vadd.f32 1e-12, %v1578_v2 }
 0x817   :  { %v1585_v52 = vadd.f32 1e-12, %v1577_v3 }
 0x818   :  { %2563 = vrsqrt.f32 %v1586_v4 }
 0x819   :  { %2565 = vrsqrt.f32 %v1585_v52 }
 0x81a   :  { %v2560_v8 = vpop.eup %2559 }
 0x81b   :  { %v2562_v11 = vpop.eup %2561  ;;  %v1592_v12 = vmul.f32 %v2560_v8, %v1580_v7 }
 0x81c   :  { %v1591_v55 = vmul.f32 %v2562_v11, %v1579_v9 }
 0x81d   :  { %v1602_v54 = vmul.f32 %v1820_v10, %v1592_v12 }
 0x81e   :  { %v1601_v15 = vmul.f32 %v1820_v10, %v1591_v55 }
 0x81f   :  { %v1612_v16 = vadd.f32 %v1821_v13, %v1602_v54 }
 0x820   :  { %v1611_v17 = vadd.f32 %v1821_v13, %v1601_v15 }
 0x822   :  { %v2564_v18 = vpop.eup %2563  ;;  %v2489_v19 = vpack.c.bf16 %v1612_v16, %v1611_v17 }
 0x823   :  { %v2566_v20 = vpop.eup %2565  ;;  %v1594_v21 = vmul.f32 %v2564_v18, %v1582_v5 }
 0x824   :  { %2490 = vmatpush3.bf16.msra.mxu0 %v2489_v19  ;;  %v1593_v22 = vmul.f32 %v2566_v20, %v1581_v6 }
 0x825   :  { %2491 = vmatprep.subr.bf16.mxu0 %v2668_v14  ;;  %v1604_v23 = vmul.f32 %v1820_v10, %v1594_v21 }
 0x826   :  { %v1603_v24 = vmul.f32 %v1820_v10, %v1593_v22 }
 0x827   :  { %v1614_v25 = vadd.f32 %v1821_v13, %v1604_v23 }
 0x828   :  { %v1613_v27 = vadd.f32 %v1821_v13, %v1603_v24 }
 0x82a   :  { %v2492_v28 = vpack.c.bf16 %v1614_v25, %v1613_v27 }
 0x82c   :  { %2493 = vmatpush3.bf16.msra.mxu0 %v2492_v28 }
 0x82f   :  { %2259 = vmatmul.mubr.msk.f32.vlgmr.msra.gmra.mrb[16].mxu0 %vm1616_vm2, %v1615_v45 }
 0x902   :  { %v1686_v44 = vpop.f32.mrb[16].mxu0 }
 0x903   :  { %2294 = vmatmul.mubr.f32.vlgmr.msra.gmra.mrb[24].mxu1 %v1686_v44  ;;  %v2260_v29 = vpop.f32.mrb[17].mxu0  ;;  %v1784_v31 = vrot.slane %v1686_v44, 2 }
 0x9d6   :  { %v1779_v14 = vpop.f32.mrb[24].mxu1 }
 0x9d7   :  { %v1780_v32 = vadd.f32 %v1823_v30, %v1779_v14  ;;  %v2295_v33 = vpop.f32.mrb[25].mxu1 }
 0x9d9   :  { %v1786_v36 = vsub.f32 %v1780_v32, %v1784_v31 }
 0x9db   :  { %v1788_v37 = vrot.slane %v1786_v36, 6 }
 0x9dd   :  { %v1790_v38 = vadd.f32 %v1788_v37, %v1686_v44 }
 0x9df   :  { %1791 = vst [vmem:[#allocation8 - $0x2] sm:$0xc] %v1790_v38 }
 0x9e0   :  { %2644 = shalt.err (!%p2641_p0)
}
 0x9e1   :  { %s2645_s8 = scalar_lea.hbm %s3271_s21, 32 }
 0x9e2   :  { %p2646_p1 = scmp.ne.s32.totalorder %s3271_s21, %s2645_s8  ;;  %p2649_p2 = scmp.lt.u32.totalorder %s2645_s8, %s3271_s21 }
 0x9e4   :  { %p2651_p3 = pnand %p2649_p2, %p2646_p1 }
 0x9e6   :  { %2654 = shalt.err (!%p2651_p3)
}
 0x9e7   :  { %1801 = dma.vmem_to_hbm [thread:$0]  %s1799_s22, 32, %s3271_s21, [#allocation4]  }
 0x9e8   :  { %2659 = dma.done.wait [#allocation4], 32  }
 0x9e9   :  { %2660 = vsyncadd [#allocation4], 4294967264 }
 0x9ea   :  { %1805 = vsyncpa [#allocation3], 1 }
 0x9eb   :  { %1806 = vsyncpa [#allocation6], 1 }
 0x9ec   :  { %1807 = vsyncpa [#allocation4], 1 }

</bundles_post_ra>
